<compile_context>
chip_gen: v7x
topology: tpu7x:2x2x1
jax: 0.10.0
libtpu: 0.0.40
codegen_flags: <defaults>
</compile_context>

<pallas_src>
import functools

import jax
import jax.numpy as jnp
from jax import lax
from jax.experimental import pallas as pl
from jax.experimental.pallas import tpu as pltpu

_LANE = 128     # lane width; VMEM pads the minor dim of every block to this
_GRAIN = 128    # node-tile granularity


def _round_up(a, b):
    return -(-a // b) * b


def _round_down(a, b):
    return (a // b) * b


def _vmem_capacity_bytes():
    try:
        return int(pltpu.get_tpu_info().vmem_capacity_bytes)
    except Exception:
        return 64 << 20   # conservative fallback (v7x per-TensorCore VMEM)


def _select_tile(n, io_itemsize, tile_n_hint):
    """Pick the node-tile size from a VMEM budget (per-generation)."""
    # Per-node-row VMEM cost, lane dim padded to 128 in VMEM (conservative):
    #   x + dec blocks (io dtype, double-buffered)
    #   mask + loss blocks (f32, double-buffered)
    #   ~8 live f32 intermediates (xm, h, hid, h2, dec, loss temps).
    per_row = (2 * _LANE * io_itemsize) * 2 \
            + (2 * _LANE * 4) * 2 \
            + 8 * _LANE * 4
    cap = _vmem_capacity_bytes()
    budget = min(int(0.55 * cap), 48 << 20)
    tile_budget = max(_GRAIN, _round_down(budget // per_row, _GRAIN))

    tile_n = min(int(tile_n_hint) if tile_n_hint else 4096, tile_budget)
    tile_n = max(_GRAIN, _round_down(tile_n, _GRAIN))

    n_grain = _round_up(n, _GRAIN)
    tile_n = min(tile_n, n_grain)
    # v7x megacore: prefer >= 2 grid steps so both TensorCores get work.
    if n_grain >= 2 * _GRAIN:
        tile_n = min(tile_n, max(_GRAIN, _round_down(n_grain // 2, _GRAIN)))

    n_pad = _round_up(n, tile_n)
    vmem_limit = max(32 << 20, min(int(0.9 * cap), 100 << 20))
    return tile_n, n_pad, vmem_limit


def _hgae_kernel(x_ref, m_ref,
                 w1e_ref, b1e_ref,
                 wf_ref, bf_ref,
                 w1d_ref, b1d_ref,
                 w2d_ref, b2d_ref,
                 dec_ref, loss_ref,
                 *, gamma):
    """Fused HGAE forward for one (tile_n, Din) row block of nodes.

    x_ref    : (TN, Din)  original node features (f32 or bf16)
    m_ref    : (TN, 1)    1.0 for masked nodes, 0.0 otherwise (f32)
    dec_ref  : (TN, Din)  reconstructed features (same dtype as x)
    loss_ref : (TN, 1)    per-node SCE loss term, already weighted by mask
    """
    xf = x_ref[...].astype(jnp.float32)          # f32 copy for the loss epilogue
    m = m_ref[...]                               # (TN, 1)
    keep = 1.0 - m
    mm_dtype = w1e_ref.dtype                     # matmul streaming dtype

    # --- encode_mask_noise: zero masked node rows -----------------------------
    xm = (xf * keep).astype(mm_dtype)

    # --- encoder fc1 -> ReLU ---------------------------------------------------
    h = jnp.dot(xm, w1e_ref[...], preferred_element_type=jnp.float32) + b1e_ref[...]
    h = jnp.maximum(h, 0.0)

    # --- fused (encoder fc2 + encoder_to_decoder) ------------------------------
    #     hid = h @ (We2d @ W2e)^T + (We2d @ b2e)
    hid = jnp.dot(h.astype(mm_dtype), wf_ref[...],
                  preferred_element_type=jnp.float32) + bf_ref[...]

    # --- hidden_rep[mask_nodes] = 0 --------------------------------------------
    hid = hid * keep

    # --- decoder fc1 -> ReLU -> fc2 ---------------------------------------------
    h2 = jnp.dot(hid.astype(mm_dtype), w1d_ref[...],
                 preferred_element_type=jnp.float32) + b1d_ref[...]
    h2 = jnp.maximum(h2, 0.0)
    dec = jnp.dot(h2.astype(mm_dtype), w2d_ref[...],
                  preferred_element_type=jnp.float32) + b2d_ref[...]
    dec_ref[...] = dec.astype(dec_ref.dtype)

    # --- SCE loss: (1 - cos(x, dec))^gamma, weighted by mask (f32 epilogue) ----
    eps = 1e-12
    dot = jnp.sum(xf * dec, axis=1, keepdims=True)          # (TN, 1)
    ssx = jnp.sum(xf * xf, axis=1, keepdims=True)
    ssd = jnp.sum(dec * dec, axis=1, keepdims=True)
    # 1 / max(||v||, eps)  ==  rsqrt(max(||v||^2, eps^2))
    cos = dot * lax.rsqrt(jnp.maximum(ssx, eps * eps)) \
              * lax.rsqrt(jnp.maximum(ssd, eps * eps))
    base = jnp.maximum(1.0 - cos, 0.0)
    if gamma == 2.0:
        powed = base * base
    elif gamma == 1.0:
        powed = base
    else:
        safe = jnp.maximum(base, 1e-30)
        powed = jnp.where(base > 0.0, jnp.exp(gamma * jnp.log(safe)), 0.0)
    loss_ref[...] = powed * m


def hgae_forward(x, mask_vec, params, *, gamma, tile_n=None):
    """Fused HGAE forward (MLP encoder / MLP decoder path).

    x        : (N, Din)  node features (float32, or bfloat16 to halve the HBM
                         streaming of x and dec_rep)
    mask_vec : (N, 1)    1.0 for masked nodes, 0.0 otherwise
    params   : PyTorch-layout weights: w* = [out_dim, in_dim], b* = [out_dim]
    Returns (loss_scalar, dec_rep[N, Din]) with dec_rep in x.dtype.
    """
    n, din = x.shape
    h1e = params["w1e"].shape[0]
    hidden = params["we2d"].shape[0]
    h1d = params["w1d"].shape[0]

    mm_dtype = x.dtype
    io_itemsize = jnp.dtype(mm_dtype).itemsize
    tile, n_pad, vmem_limit = _select_tile(n, io_itemsize, tile_n)
    pad = n_pad - n

    # Row blocks: no HBM transpose of x / dec_rep.  Padding only when needed
    # (padded rows carry mask = 0 -> zero loss contribution, dec rows sliced off).
    x_in = jnp.pad(x, ((0, pad), (0, 0))) if pad else x
    m_f32 = mask_vec.astype(jnp.float32)
    m_in = jnp.pad(m_f32, ((0, pad), (0, 0))) if pad else m_f32

    # One-time prep of the tiny weights: transpose to [in, out] so every
    # in-kernel matmul is a plain row-major jnp.dot, and fuse encoder fc2 with
    # the bias-free encoder_to_decoder linear.
    w1eT = params["w1e"].T.astype(mm_dtype)                      # (Din, h1e)
    b1e = params["b1e"].reshape(1, h1e).astype(jnp.float32)
    wfT = (params["we2d"] @ params["w2e"]).T.astype(mm_dtype)    # (h1e, hidden)
    bf = (params["we2d"] @ params["b2e"]).reshape(1, hidden).astype(jnp.float32)
    w1dT = params["w1d"].T.astype(mm_dtype)                      # (hidden, h1d)
    b1d = params["b1d"].reshape(1, h1d).astype(jnp.float32)
    w2dT = params["w2d"].T.astype(mm_dtype)                      # (h1d, Din)
    b2d = params["b2d"].reshape(1, din).astype(jnp.float32)

    def row_spec(cols):
        return pl.BlockSpec((tile, cols), lambda i: (i, 0))

    def full_spec(shape):
        # Constant index_map: fetched once, stays resident across grid steps.
        return pl.BlockSpec(shape, lambda i: (0, 0))

    kernel = functools.partial(_hgae_kernel, gamma=float(gamma))

    dec_pad, loss_terms = pl.pallas_call(
        kernel,
        out_shape=(
            jax.ShapeDtypeStruct((n_pad, din), mm_dtype),
            jax.ShapeDtypeStruct((n_pad, 1), jnp.float32),
        ),
        grid_spec=pltpu.PrefetchScalarGridSpec(
            num_scalar_prefetch=0,
            grid=(n_pad // tile,),
            in_specs=[
                row_spec(din),                 # x rows
                row_spec(1),                   # mask column
                full_spec((din, h1e)),         # enc fc1 W^T
                full_spec((1, h1e)),           # enc fc1 b
                full_spec((h1e, hidden)),      # fused (e2d @ enc fc2)^T
                full_spec((1, hidden)),        # fused bias
                full_spec((hidden, h1d)),      # dec fc1 W^T
                full_spec((1, h1d)),           # dec fc1 b
                full_spec((h1d, din)),         # dec fc2 W^T
                full_spec((1, din)),           # dec fc2 b
            ],
            out_specs=[row_spec(din), row_spec(1)],
        ),
        compiler_params=pltpu.CompilerParams(
            dimension_semantics=("parallel",),
            vmem_limit_bytes=vmem_limit),
    )(x_in, m_in, w1eT, b1e, wfT, bf, w1dT, b1d, w2dT, b2d)

    dec_rep = dec_pad[:n] if pad else dec_pad
    num_mask = jnp.maximum(jnp.sum(m_f32), 1.0)
    loss = jnp.sum(loss_terms) / num_mask   # padded / unmasked rows are already 0
    return loss, dec_rep


def _reference_forward(x, mask_vec, p, gamma):
    """Plain-JAX f32 reference of the same forward pass (PyTorch Linear layout)."""
    keep = 1.0 - mask_vec
    xm = x * keep
    h = jnp.maximum(xm @ p["w1e"].T + p["b1e"], 0.0)
    enc = h @ p["w2e"].T + p["b2e"]
    hid = (enc @ p["we2d"].T) * keep
    h2 = jnp.maximum(hid @ p["w1d"].T + p["b1d"], 0.0)
    dec = h2 @ p["w2d"].T + p["b2d"]
    eps = 1e-12
    xn = x / jnp.maximum(jnp.linalg.norm(x, axis=-1, keepdims=True), eps)
    dn = dec / jnp.maximum(jnp.linalg.norm(dec, axis=-1, keepdims=True), eps)
    cos = jnp.sum(xn * dn, axis=-1, keepdims=True)
    terms = jnp.maximum(1.0 - cos, 0.0) ** gamma * mask_vec
    loss = jnp.sum(terms) / jnp.maximum(jnp.sum(mask_vec), 1.0)
    return loss, dec


if __name__ == "__main__":
    # Small shapes consistent with the module:
    #   num_nodes (target ntype) = 128, target_in_dim = 16, hidden_dim = 32
    #   mask_rate = 0.5, gamma = 2.0
    #   MLP hidden = input_dim * 2  -> encoder 32, decoder 64
    N, DIN, HIDDEN = 128, 16, 32
    MASK_RATE, GAMMA = 0.5, 2.0
    H1E, H1D = 2 * DIN, 2 * HIDDEN

    key = jax.random.PRNGKey(0)
    kx, kperm, k1, k2, k3, k4, k5 = jax.random.split(key, 7)

    # Node features for the target node type.
    x = jax.random.normal(kx, (N, DIN), dtype=jnp.float32)

    # encode_mask_noise: random permutation, first mask_rate*N nodes masked.
    perm = jax.random.permutation(kperm, N)
    num_mask = int(MASK_RATE * N)
    mask_nodes = perm[:num_mask]
    mask_vec = jnp.zeros((N, 1), jnp.float32).at[mask_nodes, 0].set(1.0)

    def init_linear(kw, fan_in, fan_out):
        # PyTorch nn.Linear layout: W [out, in], b [out]
        scale = 1.0 / jnp.sqrt(fan_in)
        w = jax.random.uniform(kw, (fan_out, fan_in), jnp.float32, -scale, scale)
        b = jnp.zeros((fan_out,), jnp.float32)
        return w, b

    w1e, b1e = init_linear(k1, DIN, H1E)          # encoder fc1
    w2e, b2e = init_linear(k2, H1E, HIDDEN)       # encoder fc2 (out = hidden)
    we2d, _ = init_linear(k3, HIDDEN, HIDDEN)     # encoder_to_decoder (no bias)
    w1d, b1d = init_linear(k4, HIDDEN, H1D)       # decoder fc1
    w2d, b2d = init_linear(k5, H1D, DIN)          # decoder fc2 (out = target_in_dim)

    params = dict(w1e=w1e, b1e=b1e, w2e=w2e, b2e=b2e, we2d=we2d,
                  w1d=w1d, b1d=b1d, w2d=w2d, b2d=b2d)

    ref_loss, ref_dec = _reference_forward(x, mask_vec, params, GAMMA)

    # f32 path (module-default numerics).
    loss, dec_rep = hgae_forward(x, mask_vec, params, gamma=GAMMA)
    jax.block_until_ready((loss, dec_rep))
    assert jnp.allclose(dec_rep, ref_dec, rtol=2e-3, atol=2e-3), "dec_rep mismatch (f32)"
    assert jnp.allclose(loss, ref_loss, rtol=2e-3, atol=2e-3), "loss mismatch (f32)"

    # bf16 streaming path (halved HBM traffic for x / dec_rep), looser tolerance.
    loss_bf, dec_bf = hgae_forward(x.astype(jnp.bfloat16), mask_vec, params, gamma=GAMMA)
    jax.block_until_ready((loss_bf, dec_bf))
    assert jnp.allclose(dec_bf.astype(jnp.float32), ref_dec,
                        rtol=8e-2, atol=8e-2), "dec_rep mismatch (bf16)"
    assert jnp.allclose(loss_bf.astype(jnp.float32), ref_loss,
                        rtol=8e-2, atol=8e-2), "loss mismatch (bf16)"

    print("KERNEL_OK")
</pallas_src>

<mosaic_0001>
module attributes {stable_mosaic.version = 11 : i64} {
  func.func @_hgae_kernel(%arg0: i32, %arg1: memref<128x16xf32, #tpu.memory_space<vmem>>, %arg2: memref<128x1xf32, #tpu.memory_space<vmem>>, %arg3: memref<16x32xf32, #tpu.memory_space<vmem>>, %arg4: memref<1x32xf32, #tpu.memory_space<vmem>>, %arg5: memref<32x32xf32, #tpu.memory_space<vmem>>, %arg6: memref<1x32xf32, #tpu.memory_space<vmem>>, %arg7: memref<32x64xf32, #tpu.memory_space<vmem>>, %arg8: memref<1x64xf32, #tpu.memory_space<vmem>>, %arg9: memref<64x16xf32, #tpu.memory_space<vmem>>, %arg10: memref<1x16xf32, #tpu.memory_space<vmem>>, %arg11: memref<128x16xf32, #tpu.memory_space<vmem>>, %arg12: memref<128x1xf32, #tpu.memory_space<vmem>>) attributes {dimension_semantics = [#tpu.dimension_semantics<parallel>], iteration_bounds = array<i64: 1>, scalar_prefetch = 0 : i64, scratch_operands = 0 : i64, tpu.core_type = #tpu.core_type<tc>, window_params = [{transform_indices = @transform_0, window_bounds = array<i64: 128, 16>}, {transform_indices = @transform_1, window_bounds = array<i64: 128, 1>}, {pipeline_mode = #tpu.pipeline_mode<synchronous>, transform_indices = @transform_2, window_bounds = array<i64: 16, 32>}, {pipeline_mode = #tpu.pipeline_mode<synchronous>, transform_indices = @transform_3, window_bounds = array<i64: 1, 32>}, {pipeline_mode = #tpu.pipeline_mode<synchronous>, transform_indices = @transform_4, window_bounds = array<i64: 32, 32>}, {pipeline_mode = #tpu.pipeline_mode<synchronous>, transform_indices = @transform_5, window_bounds = array<i64: 1, 32>}, {pipeline_mode = #tpu.pipeline_mode<synchronous>, transform_indices = @transform_6, window_bounds = array<i64: 32, 64>}, {pipeline_mode = #tpu.pipeline_mode<synchronous>, transform_indices = @transform_7, window_bounds = array<i64: 1, 64>}, {pipeline_mode = #tpu.pipeline_mode<synchronous>, transform_indices = @transform_8, window_bounds = array<i64: 64, 16>}, {pipeline_mode = #tpu.pipeline_mode<synchronous>, transform_indices = @transform_9, window_bounds = array<i64: 1, 16>}, {transform_indices = @transform_10, window_bounds = array<i64: 128, 16>}, {transform_indices = @transform_11, window_bounds = array<i64: 128, 1>}]} {
    %c0 = arith.constant 0 : index
    %c0_0 = arith.constant 0 : index
    %0 = vector.load %arg1[%c0, %c0_0] : memref<128x16xf32, #tpu.memory_space<vmem>>, vector<128x16xf32>
    %c0_1 = arith.constant 0 : index
    %c0_2 = arith.constant 0 : index
    %1 = vector.load %arg2[%c0_1, %c0_2] : memref<128x1xf32, #tpu.memory_space<vmem>>, vector<128x1xf32>
    %cst = arith.constant 1.000000e+00 : f32
    %2 = vector.broadcast %cst : f32 to vector<128x1xf32>
    %3 = arith.subf %2, %1 : vector<128x1xf32>
    %4 = vector.broadcast %3 : vector<128x1xf32> to vector<128x16xf32>
    %5 = arith.mulf %0, %4 : vector<128x16xf32>
    %c0_3 = arith.constant 0 : index
    %c0_4 = arith.constant 0 : index
    %6 = vector.load %arg3[%c0_3, %c0_4] : memref<16x32xf32, #tpu.memory_space<vmem>>, vector<16x32xf32>
    %cst_5 = arith.constant dense<0.000000e+00> : vector<128x32xf32>
    %7 = tpu.matmul %5, %6, %cst_5 {dimension_numbers = #tpu.dot_dimension_numbers<[1], [0], [0], [1], [0, 0, 1, 1], [], []>} : vector<128x16xf32>, vector<16x32xf32>, vector<128x32xf32> -> vector<128x32xf32>
    %c0_6 = arith.constant 0 : index
    %c0_7 = arith.constant 0 : index
    %8 = vector.load %arg4[%c0_6, %c0_7] : memref<1x32xf32, #tpu.memory_space<vmem>>, vector<1x32xf32>
    %9 = vector.broadcast %8 : vector<1x32xf32> to vector<128x32xf32>
    %10 = arith.addf %7, %9 : vector<128x32xf32>
    %cst_8 = arith.constant 0.000000e+00 : f32
    %11 = vector.broadcast %cst_8 : f32 to vector<128x32xf32>
    %12 = arith.maximumf %10, %11 : vector<128x32xf32>
    %c0_9 = arith.constant 0 : index
    %c0_10 = arith.constant 0 : index
    %13 = vector.load %arg5[%c0_9, %c0_10] : memref<32x32xf32, #tpu.memory_space<vmem>>, vector<32x32xf32>
    %cst_11 = arith.constant dense<0.000000e+00> : vector<128x32xf32>
    %14 = tpu.matmul %12, %13, %cst_11 {dimension_numbers = #tpu.dot_dimension_numbers<[1], [0], [0], [1], [0, 0, 1, 1], [], []>} : vector<128x32xf32>, vector<32x32xf32>, vector<128x32xf32> -> vector<128x32xf32>
    %c0_12 = arith.constant 0 : index
    %c0_13 = arith.constant 0 : index
    %15 = vector.load %arg6[%c0_12, %c0_13] : memref<1x32xf32, #tpu.memory_space<vmem>>, vector<1x32xf32>
    %16 = vector.broadcast %15 : vector<1x32xf32> to vector<128x32xf32>
    %17 = arith.addf %14, %16 : vector<128x32xf32>
    %18 = vector.broadcast %3 : vector<128x1xf32> to vector<128x32xf32>
    %19 = arith.mulf %17, %18 : vector<128x32xf32>
    %c0_14 = arith.constant 0 : index
    %c0_15 = arith.constant 0 : index
    %20 = vector.load %arg7[%c0_14, %c0_15] : memref<32x64xf32, #tpu.memory_space<vmem>>, vector<32x64xf32>
    %cst_16 = arith.constant dense<0.000000e+00> : vector<128x64xf32>
    %21 = tpu.matmul %19, %20, %cst_16 {dimension_numbers = #tpu.dot_dimension_numbers<[1], [0], [0], [1], [0, 0, 1, 1], [], []>} : vector<128x32xf32>, vector<32x64xf32>, vector<128x64xf32> -> vector<128x64xf32>
    %c0_17 = arith.constant 0 : index
    %c0_18 = arith.constant 0 : index
    %22 = vector.load %arg8[%c0_17, %c0_18] : memref<1x64xf32, #tpu.memory_space<vmem>>, vector<1x64xf32>
    %23 = vector.broadcast %22 : vector<1x64xf32> to vector<128x64xf32>
    %24 = arith.addf %21, %23 : vector<128x64xf32>
    %cst_19 = arith.constant 0.000000e+00 : f32
    %25 = vector.broadcast %cst_19 : f32 to vector<128x64xf32>
    %26 = arith.maximumf %24, %25 : vector<128x64xf32>
    %c0_20 = arith.constant 0 : index
    %c0_21 = arith.constant 0 : index
    %27 = vector.load %arg9[%c0_20, %c0_21] : memref<64x16xf32, #tpu.memory_space<vmem>>, vector<64x16xf32>
    %cst_22 = arith.constant dense<0.000000e+00> : vector<128x16xf32>
    %28 = tpu.matmul %26, %27, %cst_22 {dimension_numbers = #tpu.dot_dimension_numbers<[1], [0], [0], [1], [0, 0, 1, 1], [], []>} : vector<128x64xf32>, vector<64x16xf32>, vector<128x16xf32> -> vector<128x16xf32>
    %c0_23 = arith.constant 0 : index
    %c0_24 = arith.constant 0 : index
    %29 = vector.load %arg10[%c0_23, %c0_24] : memref<1x16xf32, #tpu.memory_space<vmem>>, vector<1x16xf32>
    %30 = vector.broadcast %29 : vector<1x16xf32> to vector<128x16xf32>
    %31 = arith.addf %28, %30 : vector<128x16xf32>
    %c0_25 = arith.constant 0 : index
    %c0_26 = arith.constant 0 : index
    %32 = vector.load %arg11[%c0_25, %c0_26] : memref<128x16xf32, #tpu.memory_space<vmem>>, vector<128x16xf32>
    tpu.vector_store %arg11[%c0_25, %c0_26], %31 {strides = array<i32>} : memref<128x16xf32, #tpu.memory_space<vmem>>, vector<128x16xf32>,
    %33 = arith.mulf %0, %31 : vector<128x16xf32>
    %cst_27 = arith.constant dense<0.000000e+00> : vector<128xf32>
    %34 = vector.multi_reduction <add>, %33, %cst_27 [1] : vector<128x16xf32> to vector<128xf32>
    %35 = vector.shape_cast %34 : vector<128xf32> to vector<128x1xf32>
    %36 = arith.mulf %0, %0 : vector<128x16xf32>
    %cst_28 = arith.constant dense<0.000000e+00> : vector<128xf32>
    %37 = vector.multi_reduction <add>, %36, %cst_28 [1] : vector<128x16xf32> to vector<128xf32>
    %38 = vector.shape_cast %37 : vector<128xf32> to vector<128x1xf32>
    %39 = arith.mulf %31, %31 : vector<128x16xf32>
    %cst_29 = arith.constant dense<0.000000e+00> : vector<128xf32>
    %40 = vector.multi_reduction <add>, %39, %cst_29 [1] : vector<128x16xf32> to vector<128xf32>
    %41 = vector.shape_cast %40 : vector<128xf32> to vector<128x1xf32>
    %cst_30 = arith.constant 1.000000e-24 : f32
    %42 = vector.broadcast %cst_30 : f32 to vector<128x1xf32>
    %43 = arith.maximumf %38, %42 : vector<128x1xf32>
    %44 = math.rsqrt %43 : vector<128x1xf32>
    %45 = arith.mulf %35, %44 : vector<128x1xf32>
    %cst_31 = arith.constant 1.000000e-24 : f32
    %46 = vector.broadcast %cst_31 : f32 to vector<128x1xf32>
    %47 = arith.maximumf %41, %46 : vector<128x1xf32>
    %48 = math.rsqrt %47 : vector<128x1xf32>
    %49 = arith.mulf %45, %48 : vector<128x1xf32>
    %cst_32 = arith.constant 1.000000e+00 : f32
    %50 = vector.broadcast %cst_32 : f32 to vector<128x1xf32>
    %51 = arith.subf %50, %49 : vector<128x1xf32>
    %cst_33 = arith.constant 0.000000e+00 : f32
    %52 = vector.broadcast %cst_33 : f32 to vector<128x1xf32>
    %53 = arith.maximumf %51, %52 : vector<128x1xf32>
    %54 = arith.mulf %53, %53 : vector<128x1xf32>
    %55 = arith.mulf %54, %1 : vector<128x1xf32>
    %c0_34 = arith.constant 0 : index
    %c0_35 = arith.constant 0 : index
    %56 = vector.load %arg12[%c0_34, %c0_35] : memref<128x1xf32, #tpu.memory_space<vmem>>, vector<128x1xf32>
    tpu.vector_store %arg12[%c0_34, %c0_35], %55 {strides = array<i32>} : memref<128x1xf32, #tpu.memory_space<vmem>>, vector<128x1xf32>,
    return
  }
  func.func @transform_0(%arg0: i32) -> (i32, i32) {
    %c0_i32 = arith.constant 0 : i32
    %c0_i32_0 = arith.constant 0 : i32
    return %arg0, %c0_i32 : i32, i32
  }
  func.func @transform_1(%arg0: i32) -> (i32, i32) {
    %c0_i32 = arith.constant 0 : i32
    %c0_i32_0 = arith.constant 0 : i32
    return %arg0, %c0_i32 : i32, i32
  }
  func.func @transform_2(%arg0: i32) -> (i32, i32) {
    %c0_i32 = arith.constant 0 : i32
    %c0_i32_0 = arith.constant 0 : i32
    %c0_i32_1 = arith.constant 0 : i32
    return %c0_i32, %c0_i32_0 : i32, i32
  }
  func.func @transform_3(%arg0: i32) -> (i32, i32) {
    %c0_i32 = arith.constant 0 : i32
    %c0_i32_0 = arith.constant 0 : i32
    %c0_i32_1 = arith.constant 0 : i32
    return %c0_i32, %c0_i32_0 : i32, i32
  }
  func.func @transform_4(%arg0: i32) -> (i32, i32) {
    %c0_i32 = arith.constant 0 : i32
    %c0_i32_0 = arith.constant 0 : i32
    %c0_i32_1 = arith.constant 0 : i32
    return %c0_i32, %c0_i32_0 : i32, i32
  }
  func.func @transform_5(%arg0: i32) -> (i32, i32) {
    %c0_i32 = arith.constant 0 : i32
    %c0_i32_0 = arith.constant 0 : i32
    %c0_i32_1 = arith.constant 0 : i32
    return %c0_i32, %c0_i32_0 : i32, i32
  }
  func.func @transform_6(%arg0: i32) -> (i32, i32) {
    %c0_i32 = arith.constant 0 : i32
    %c0_i32_0 = arith.constant 0 : i32
    %c0_i32_1 = arith.constant 0 : i32
    return %c0_i32, %c0_i32_0 : i32, i32
  }
  func.func @transform_7(%arg0: i32) -> (i32, i32) {
    %c0_i32 = arith.constant 0 : i32
    %c0_i32_0 = arith.constant 0 : i32
    %c0_i32_1 = arith.constant 0 : i32
    return %c0_i32, %c0_i32_0 : i32, i32
  }
  func.func @transform_8(%arg0: i32) -> (i32, i32) {
    %c0_i32 = arith.constant 0 : i32
    %c0_i32_0 = arith.constant 0 : i32
    %c0_i32_1 = arith.constant 0 : i32
    return %c0_i32, %c0_i32_0 : i32, i32
  }
  func.func @transform_9(%arg0: i32) -> (i32, i32) {
    %c0_i32 = arith.constant 0 : i32
    %c0_i32_0 = arith.constant 0 : i32
    %c0_i32_1 = arith.constant 0 : i32
    return %c0_i32, %c0_i32_0 : i32, i32
  }
  func.func @transform_10(%arg0: i32) -> (i32, i32) {
    %c0_i32 = arith.constant 0 : i32
    %c0_i32_0 = arith.constant 0 : i32
    return %arg0, %c0_i32 : i32, i32
  }
  func.func @transform_11(%arg0: i32) -> (i32, i32) {
    %c0_i32 = arith.constant 0 : i32
    %c0_i32_0 = arith.constant 0 : i32
    return %arg0, %c0_i32 : i32, i32
  }
}

</mosaic_0001>

<bundles_post_ra>
// kernel: tpu_custom_call.1
= control target key start
LH: loop header
LB: loop body
LE: loop exit
PB: predicated region body
PF: predicated region fallthrough
CT: control target
= control target key end

     0   :  { %v1844_v0 = vmov 0   ;;  %vm190_vm0 = vcmask 130048   ;;  %vm411_vm1 = vcmask 261120   ;;  %vm856_vm2 = vcmask 523264   ;;  %s2584_s1 = inlined_call_operand.vmem [shape: f32[128,1], index: 1, kind: input, shape index: {}]   ;;  %s2585_s2 = inlined_call_operand.vmem [shape: f32[16,32], index: 2, kind: input, shape index: {}]   ;;  %s2586_s4 = inlined_call_operand.vmem [shape: f32[32,32], index: 4, kind: input, shape index: {}]   ;;  %s2587_s0 = inlined_call_operand.vmem [shape: f32[128,16], index: 0, kind: input, shape index: {}]   ;;  %s2588_s6 = inlined_call_operand.vmem [shape: f32[32,64], index: 6, kind: input, shape index: {}]   ;;  %s2589_s3 = inlined_call_operand.vmem [shape: f32[1,32], index: 3, kind: input, shape index: {}]   ;;  %s2590_s8 = inlined_call_operand.vmem [shape: f32[64,16], index: 8, kind: input, shape index: {}]   ;;  %s2591_s5 = inlined_call_operand.vmem [shape: f32[1,32], index: 5, kind: input, shape index: {}]   ;;  %s2592_s7 = inlined_call_operand.vmem [shape: f32[1,64], index: 7, kind: input, shape index: {}]   ;;  %s2593_s9 = inlined_call_operand.vmem [shape: f32[1,16], index: 9, kind: input, shape index: {}]   ;;  %s2594_s10 = inlined_call_operand.vmem [shape: f32[128,16], index: 10, kind: output, shape index: {0}]   ;;  %s2595_s11 = inlined_call_operand.vmem [shape: f32[128,1], index: 11, kind: output, shape index: {1}]  }
   0x1   :  { %1763 = vset.pattern.permute.xlu1 %v1844_v0  ;;  %1762 = vset.pattern.permute.xlu0 %v1844_v0  ;;  %v55_v1 = vld [vmem:[%s2584_s1 + $0x10] sm:$0xff]  ;;  %v53_v2 = vld [vmem:[%s2584_s1] sm:$0xff]  ;;  %v56_v3 = vld [vmem:[%s2584_s1 + $0x18] sm:$0xff]  ;;  %vm1418_vm3 = vcmask 7168  }
   0x2   :  { %v71_v4 = vsub.f32 1.0, %v55_v1  ;;  %v69_v5 = vsub.f32 1.0, %v53_v2  ;;  %v54_v6 = vld [vmem:[%s2584_s1 + $0x8] sm:$0xff]  ;;  %v72_v7 = vsub.f32 1.0, %v56_v3  ;;  %v57_v10 = vld [vmem:[%s2584_s1 + $0x20] sm:$0xff]  ;;  %v60_v16 = vld [vmem:[%s2584_s1 + $0x38] sm:$0xff] }
   0x3   :  { %v70_v8 = vsub.f32 1.0, %v54_v6  ;;  %v58_v9 = vld [vmem:[%s2584_s1 + $0x28] sm:$0xff]  ;;  %v181_v11 = vld [vmem:[%s2585_s2] sm:$0xff]  ;;  %v73_v14 = vsub.f32 1.0, %v57_v10  ;;  %v59_v17 = vld [vmem:[%s2584_s1 + $0x30] sm:$0xff]  ;;  %v76_v18 = vsub.f32 1.0, %v60_v16 }
   0x4   :  { %97 = vperm.xlu1 %1763, %v71_v4   ;;  %87 = vperm.xlu0 %1762, %v69_v5   ;;  %v182_v12 = vld [vmem:[%s2585_s2 + $0x8] sm:$0xff]  ;;  %v74_v13 = vsub.f32 1.0, %v58_v9  ;;  %v75_v19 = vsub.f32 1.0, %v59_v17  ;;  %v61_v21 = vld [vmem:[%s2584_s1 + $0x40] sm:$0xff]  ;;  %v64_v24 = vld [vmem:[%s2584_s1 + $0x58] sm:$0xff] }
   0x5   :  { %v1725_v15 = vpack.c.bf16 %v182_v12, %v181_v11  ;;  %v62_v20 = vld [vmem:[%s2584_s1 + $0x48] sm:$0xff]  ;;  %v77_v23 = vsub.f32 1.0, %v61_v21  ;;  %v63_v25 = vld [vmem:[%s2584_s1 + $0x50] sm:$0xff]  ;;  %v80_v26 = vsub.f32 1.0, %v64_v24  ;;  %v65_v29 = vld [vmem:[%s2584_s1 + $0x60] sm:$0xff] }
   0x6   :  { %v78_v22 = vsub.f32 1.0, %v62_v20  ;;  %v79_v27 = vsub.f32 1.0, %v63_v25  ;;  %v66_v28 = vld [vmem:[%s2584_s1 + $0x68] sm:$0xff]  ;;  %v81_v31 = vsub.f32 1.0, %v65_v29  ;;  %v68_v32 = vld [vmem:[%s2584_s1 + $0x78] sm:$0xff]  ;;  %v67_v33 = vld [vmem:[%s2584_s1 + $0x70] sm:$0xff] }
   0x7   :  { %1726 = vmatprep.subr.bf16.mxu0 %v1725_v15  ;;  %v82_v30 = vsub.f32 1.0, %v66_v28  ;;  %v84_v34 = vsub.f32 1.0, %v68_v32  ;;  %v83_v35 = vsub.f32 1.0, %v67_v33  ;;  %v400_v36 = vld [vmem:[%s2586_s4] sm:$0xff]  ;;  %v401_v37 = vld [vmem:[%s2586_s4 + $0x8] sm:$0xff]  ;;  %v1977_v42 = vld [vmem:[%s2587_s0 + $0x10] sm:$0xff] }
   0x8   :  { %102 = vperm.xlu1 %1763, %v72_v7   ;;  %92 = vperm.xlu0 %1762, %v70_v8   ;;  %v1729_v38 = vpack.c.bf16 %v401_v37, %v400_v36  ;;  %v1968_v39 = vld [vmem:[%s2587_s0] sm:$0xff]  ;;  %v1984_v44 = vld [vmem:[%s2587_s0 + $0x8] sm:$0xff]  ;;  %v1994_v47 = vld [vmem:[%s2587_s0 + $0x18] sm:$0xff] }
   0x9   :  { %1728 = vmatpush3.bf16.msra.mxu0 %v1725_v15  ;;  %v2003_v50 = vld [vmem:[%s2587_s0 + $0x20] sm:$0xff]  ;;  %v2013_v53 = vld [vmem:[%s2587_s0 + $0x28] sm:$0xff]  ;;  %v2023_v56 = vld [vmem:[%s2587_s0 + $0x30] sm:$0xff] }
   0xa   :  { %1730 = vmatprep.subr.bf16.mxu1 %v1729_v38  ;;  %v2038_v61 = vld [vmem:[%s2587_s0 + $0x38] sm:$0xff]  ;;  %v2043_v62 = vld [vmem:[%s2587_s0 + $0x40] sm:$0xff]  ;;  %v2058_v3 = vld [vmem:[%s2587_s0 + $0x48] sm:$0xff] }
   0xb   :  { %1732 = vmatpush3.bf16.msra.mxu1 %v1729_v38  ;;  %v2063_v4 = vld [vmem:[%s2587_s0 + $0x50] sm:$0xff]  ;;  %v2078_v9 = vld [vmem:[%s2587_s0 + $0x58] sm:$0xff]  ;;  %v2083_v10 = vld [vmem:[%s2587_s0 + $0x60] sm:$0xff] }
   0xc   :  { %112 = vperm.xlu1 %1763, %v74_v13   ;;  %107 = vperm.xlu0 %1762, %v73_v14   ;;  %v2098_v15 = vld [vmem:[%s2587_s0 + $0x68] sm:$0xff]  ;;  %v2103_v16 = vld [vmem:[%s2587_s0 + $0x70] sm:$0xff]  ;;  %v2118_v21 = vld [vmem:[%s2587_s0 + $0x78] sm:$0xff] }
   0xd   :  { %v403_v24 = vld [vmem:[%s2586_s4 + $0x18] sm:$0xff]  ;;  %v623_v28 = vld [vmem:[%s2588_s6 + $0x10] sm:$0xff]  ;;  %v1443_v32 = vld [vmem:[%s2589_s3] ss:$0 sm:$0xff] }
  0x10   :  { %122 = vperm.xlu1 %1763, %v76_v18   ;;  %117 = vperm.xlu0 %1762, %v75_v19  }
  0x14   :  { %132 = vperm.xlu1 %1763, %v78_v22   ;;  %127 = vperm.xlu0 %1762, %v77_v23   ;;  %v402_v23 = vld [vmem:[%s2586_s4 + $0x10] sm:$0xff] }
  0x15   :  { %v1733_v25 = vpack.c.bf16 %v403_v24, %v402_v23 }
  0x17   :  { %1734 = vmatprep.subr.bf16.mxu1 %v1733_v25 }
  0x18   :  { %142 = vperm.xlu1 %1763, %v80_v26   ;;  %137 = vperm.xlu0 %1762, %v79_v27   ;;  %v621_v26 = vld [vmem:[%s2588_s6] sm:$0xff]  ;;  %v622_v27 = vld [vmem:[%s2588_s6 + $0x8] sm:$0xff] }
  0x19   :  { %1736 = vmatpush3.bf16.msra.mxu1 %v1733_v25  ;;  %v1737_v29 = vpack.c.bf16 %v622_v27, %v621_v26 }
  0x1b   :  { %1738 = vmatprep.subr.bf16.mxu0 %v1737_v29 }
  0x1c   :  { %152 = vperm.xlu1 %1763, %v82_v30   ;;  %147 = vperm.xlu0 %1762, %v81_v31   ;;  %v624_v30 = vld [vmem:[%s2588_s6 + $0x18] sm:$0xff] }
  0x1d   :  { %v1741_v31 = vpack.c.bf16 %v624_v30, %v623_v28 }
  0x20   :  { %162 = vperm.xlu1 %1763, %v84_v34   ;;  %157 = vperm.xlu0 %1762, %v83_v35  }
  0x83   :  { %v1970_v40 = vpop.permute.xlu1 %97  ;;  %v1972_v41 = vpop.permute.xlu0 %87 }
  0x84   :  { %v165_v43 = vmul.f32 %v1972_v41, %v1968_v39  ;;  %v167_v45 = vmul.f32 %v1970_v40, %v1977_v42 }
  0x86   :  { %1597 = vmatprep.mubr.msk.f32.mxu0 %vm190_vm0, %v165_v43 }
  0x87   :  { %v1989_v46 = vpop.permute.xlu1 %102  ;;  %v1996_v48 = vpop.permute.xlu0 %92 }
  0x88   :  { %v166_v49 = vmul.f32 %v1996_v48, %v1984_v44  ;;  %v168_v51 = vmul.f32 %v1989_v46, %v1994_v47 }
  0x8a   :  { %1598 = vmatmul.mubr.msk.f32.vlgmr.msra.gmra.mrb[0].mxu0 %vm190_vm0, %v166_v49 }
  0x8b   :  { %v2008_v52 = vpop.permute.xlu1 %112  ;;  %v2015_v54 = vpop.permute.xlu0 %107  ;;  %1600 = vmatprep.mubr.msk.f32.mxu0 %vm190_vm0, %v167_v45  ;;  %1740 = vmatpush3.bf16.msra.mxu0 %v1737_v29 }
  0x8c   :  { %v169_v55 = vmul.f32 %v2015_v54, %v2003_v50  ;;  %v170_v57 = vmul.f32 %v2008_v52, %v2013_v53  ;;  %1742 = vmatprep.subr.bf16.mxu0 %v1741_v31 }
  0x8e   :  { %1601 = vmatmul.mubr.msk.f32.gmra.mrb[2].mxu0 %vm190_vm0, %v168_v51 }
  0x8f   :  { %v2028_v58 = vpop.permute.xlu1 %122  ;;  %v2030_v59 = vpop.permute.xlu0 %117  ;;  %1603 = vmatprep.mubr.msk.f32.mxu0 %vm190_vm0, %v169_v55  ;;  %1744 = vmatpush3.bf16.msra.mxu0 %v1741_v31 }
  0x90   :  { %v171_v60 = vmul.f32 %v2030_v59, %v2023_v56  ;;  %v172_v1 = vmul.f32 %v2028_v58, %v2038_v61 }
  0x92   :  { %1604 = vmatmul.mubr.msk.f32.gmra.mrb[4].mxu0 %vm190_vm0, %v170_v57 }
  0x93   :  { %v2046_v63 = vpop.permute.xlu1 %132  ;;  %v2048_v0 = vpop.permute.xlu0 %127  ;;  %1606 = vmatprep.mubr.msk.f32.mxu0 %vm190_vm0, %v171_v60 }
  0x94   :  { %v173_v2 = vmul.f32 %v2048_v0, %v2043_v62  ;;  %v174_v7 = vmul.f32 %v2046_v63, %v2058_v3 }
  0x96   :  { %1607 = vmatmul.mubr.msk.f32.gmra.mrb[6].mxu0 %vm190_vm0, %v172_v1 }
  0x97   :  { %v2066_v5 = vpop.permute.xlu1 %142  ;;  %v2068_v6 = vpop.permute.xlu0 %137  ;;  %1609 = vmatprep.mubr.msk.f32.mxu0 %vm190_vm0, %v173_v2 }
  0x98   :  { %v175_v8 = vmul.f32 %v2068_v6, %v2063_v4  ;;  %v176_v13 = vmul.f32 %v2066_v5, %v2078_v9 }
  0x9a   :  { %1610 = vmatmul.mubr.msk.f32.gmra.mrb[8].mxu0 %vm190_vm0, %v174_v7 }
  0x9b   :  { %v2086_v11 = vpop.permute.xlu1 %152  ;;  %v2088_v12 = vpop.permute.xlu0 %147  ;;  %1612 = vmatprep.mubr.msk.f32.mxu0 %vm190_vm0, %v175_v8 }
  0x9c   :  { %v177_v14 = vmul.f32 %v2088_v12, %v2083_v10  ;;  %v178_v18 = vmul.f32 %v2086_v11, %v2098_v15 }
  0x9e   :  { %1613 = vmatmul.mubr.msk.f32.gmra.mrb[10].mxu0 %vm190_vm0, %v176_v13 }
  0x9f   :  { %v2106_v17 = vpop.permute.xlu0 %157  ;;  %1615 = vmatprep.mubr.msk.f32.mxu0 %vm190_vm0, %v177_v14  ;;  %v2113_v20 = vpop.permute.xlu1 %162 }
  0xa0   :  { %v179_v19 = vmul.f32 %v2106_v17, %v2103_v16  ;;  %v180_v22 = vmul.f32 %v2113_v20, %v2118_v21 }
  0xa2   :  { %1616 = vmatmul.mubr.msk.f32.gmra.mrb[12].mxu0 %vm190_vm0, %v178_v18 }
  0xa3   :  { %1618 = vmatprep.mubr.msk.f32.mxu0 %vm190_vm0, %v179_v19 }
  0xa6   :  { %1619 = vmatmul.mubr.msk.f32.gmra.mrb[14].mxu0 %vm190_vm0, %v180_v22 }
 0x15d   :  { %v1599_v33 = vpop.f32.mrb[0].mxu0 }
 0x15e   :  { %v311_v34 = vadd.f32 %v1599_v33, %v1443_v32  ;;  %v305_v35 = vpop.f32.mrb[1].mxu0 }
 0x15f   :  { %v306_v36 = vadd.f32 %v1443_v32, %v305_v35 }
 0x160   :  { %v385_v43 = vmax.f32 %v311_v34, 0.0 }
 0x161   :  { %v384_v37 = vmax.f32 %v306_v36, 0.0  ;;  %v1602_v38 = vpop.f32.mrb[2].mxu0 }
 0x162   :  { %v321_v45 = vadd.f32 %v1602_v38, %v1443_v32  ;;  %v315_v49 = vpop.f32.mrb[3].mxu0 }
 0x163   :  { %v316_v51 = vadd.f32 %v1443_v32, %v315_v49  ;;  %1629 = vmatprep.mubr.msk.f32.mxu1 %vm411_vm1, %v384_v37 }
 0x164   :  { %v387_v55 = vmax.f32 %v321_v45, 0.0  ;;  %1630 = vmatmul.mubr.msk.f32.vlgmr.msra.gmra.mrb[0].mxu1 %vm411_vm1, %v385_v43 }
 0x165   :  { %v386_v57 = vmax.f32 %v316_v51, 0.0  ;;  %v1605_v60 = vpop.f32.mrb[4].mxu0 }
 0x166   :  { %v331_v1 = vadd.f32 %v1605_v60, %v1443_v32  ;;  %v325_v2 = vpop.f32.mrb[5].mxu0 }
 0x167   :  { %v326_v7 = vadd.f32 %v1443_v32, %v325_v2  ;;  %1632 = vmatprep.mubr.msk.f32.mxu1 %vm411_vm1, %v386_v57 }
 0x168   :  { %1633 = vmatmul.mubr.msk.f32.gmra.mrb[2].mxu1 %vm411_vm1, %v387_v55  ;;  %v389_v14 = vmax.f32 %v331_v1, 0.0 }
 0x169   :  { %v388_v8 = vmax.f32 %v326_v7, 0.0  ;;  %v1608_v13 = vpop.f32.mrb[6].mxu0 }
 0x16a   :  { %v341_v18 = vadd.f32 %v1608_v13, %v1443_v32  ;;  %v335_v19 = vpop.f32.mrb[7].mxu0  ;;  %v841_v13 = vld [vmem:[%s2590_s8] sm:$0xff] }
 0x16b   :  { %v336_v22 = vadd.f32 %v1443_v32, %v335_v19  ;;  %1635 = vmatprep.mubr.msk.f32.mxu1 %vm411_vm1, %v388_v8  ;;  %v844_v19 = vld [vmem:[%s2590_s8 + $0x18] sm:$0xff] }
 0x16c   :  { %1636 = vmatmul.mubr.msk.f32.gmra.mrb[4].mxu1 %vm411_vm1, %v389_v14  ;;  %v391_v25 = vmax.f32 %v341_v18, 0.0  ;;  %v842_v14 = vld [vmem:[%s2590_s8 + $0x8] sm:$0xff] }
 0x16d   :  { %v390_v23 = vmax.f32 %v336_v22, 0.0  ;;  %v1611_v24 = vpop.f32.mrb[8].mxu0  ;;  %v1745_v18 = vpack.c.bf16 %v842_v14, %v841_v13 }
 0x16e   :  { %v351_v26 = vadd.f32 %v1611_v24, %v1443_v32  ;;  %v345_v27 = vpop.f32.mrb[9].mxu0  ;;  %v846_v24 = vld [vmem:[%s2590_s8 + $0x28] sm:$0xff] }
 0x16f   :  { %v346_v28 = vadd.f32 %v1443_v32, %v345_v27  ;;  %1638 = vmatprep.mubr.msk.f32.mxu1 %vm411_vm1, %v390_v23  ;;  %v845_v23 = vld [vmem:[%s2590_s8 + $0x20] sm:$0xff]  ;;  %1746 = vmatprep.subr.bf16.mxu1 %v1745_v18  ;;  %v848_v27 = vld [vmem:[%s2590_s8 + $0x38] sm:$0xff] }
 0x170   :  { %1639 = vmatmul.mubr.msk.f32.gmra.mrb[6].mxu1 %vm411_vm1, %v391_v25  ;;  %v393_v31 = vmax.f32 %v351_v26, 0.0  ;;  %v1753_v25 = vpack.c.bf16 %v846_v24, %v845_v23  ;;  %v847_v26 = vld [vmem:[%s2590_s8 + $0x30] sm:$0xff] }
 0x171   :  { %v392_v29 = vmax.f32 %v346_v28, 0.0  ;;  %v1614_v30 = vpop.f32.mrb[10].mxu0  ;;  %1748 = vmatpush3.bf16.msra.mxu1 %v1745_v18  ;;  %v1757_v28 = vpack.c.bf16 %v848_v27, %v847_v26 }
 0x172   :  { %v361_v33 = vadd.f32 %v1614_v30, %v1443_v32  ;;  %v355_v34 = vpop.f32.mrb[11].mxu0 }
 0x173   :  { %v356_v35 = vadd.f32 %v1443_v32, %v355_v34  ;;  %1641 = vmatprep.mubr.msk.f32.mxu1 %vm411_vm1, %v392_v29  ;;  %v1460_v29 = vld [vmem:[%s2591_s5] ss:$0 sm:$0xff] }
 0x174   :  { %1642 = vmatmul.mubr.msk.f32.gmra.mrb[8].mxu1 %vm411_vm1, %v393_v31  ;;  %v395_v38 = vmax.f32 %v361_v33, 0.0 }
 0x175   :  { %v394_v36 = vmax.f32 %v356_v35, 0.0  ;;  %v1617_v37 = vpop.f32.mrb[12].mxu0 }
 0x176   :  { %v371_v43 = vadd.f32 %v1617_v37, %v1443_v32  ;;  %v365_v45 = vpop.f32.mrb[13].mxu0 }
 0x177   :  { %v366_v49 = vadd.f32 %v1443_v32, %v365_v45  ;;  %1644 = vmatprep.mubr.msk.f32.mxu1 %vm411_vm1, %v394_v36 }
 0x178   :  { %1645 = vmatmul.mubr.msk.f32.gmra.mrb[10].mxu1 %vm411_vm1, %v395_v38  ;;  %v397_v57 = vmax.f32 %v371_v43, 0.0 }
 0x179   :  { %v396_v51 = vmax.f32 %v366_v49, 0.0  ;;  %v1620_v55 = vpop.f32.mrb[14].mxu0 }
 0x17a   :  { %v381_v60 = vadd.f32 %v1620_v55, %v1443_v32  ;;  %v375_v1 = vpop.f32.mrb[15].mxu0 }
 0x17b   :  { %v376_v2 = vadd.f32 %v1443_v32, %v375_v1  ;;  %1647 = vmatprep.mubr.msk.f32.mxu1 %vm411_vm1, %v396_v51  ;;  %v843_v32 = vld [vmem:[%s2590_s8 + $0x10] sm:$0xff] }
 0x17c   :  { %1648 = vmatmul.mubr.msk.f32.gmra.mrb[12].mxu1 %vm411_vm1, %v397_v57  ;;  %v399_v8 = vmax.f32 %v381_v60, 0.0  ;;  %v1749_v22 = vpack.c.bf16 %v844_v19, %v843_v32 }
 0x17d   :  { %v398_v7 = vmax.f32 %v376_v2, 0.0 }
 0x17e   :  { %1750 = vmatprep.subr.bf16.mxu1 %v1749_v22 }
 0x17f   :  { %1650 = vmatprep.mubr.msk.f32.mxu1 %vm411_vm1, %v398_v7  ;;  %1752 = vmatpush3.bf16.msra.mxu1 %v1749_v22 }
 0x180   :  { %1651 = vmatmul.mubr.msk.f32.gmra.mrb[14].mxu1 %vm411_vm1, %v399_v8  ;;  %1754 = vmatprep.subr.bf16.mxu1 %v1753_v25 }
 0x183   :  { %1756 = vmatpush3.bf16.msra.mxu1 %v1753_v25 }
 0x184   :  { %1758 = vmatprep.subr.bf16.mxu1 %v1757_v28 }
 0x187   :  { %1760 = vmatpush3.bf16.msra.mxu1 %v1757_v28 }
 0x237   :  { %v1631_v30 = vpop.f32.mrb[0].mxu1 }
 0x238   :  { %v532_v31 = vadd.f32 %v1631_v30, %v1460_v29  ;;  %v526_v33 = vpop.f32.mrb[1].mxu1 }
 0x239   :  { %v527_v34 = vadd.f32 %v1460_v29, %v526_v33 }
 0x23a   :  { %v606_v37 = vmul.f32 %v532_v31, %v1996_v48 }
 0x23b   :  { %v605_v35 = vmul.f32 %v527_v34, %v1972_v41  ;;  %v1634_v36 = vpop.f32.mrb[2].mxu1 }
 0x23c   :  { %v542_v38 = vadd.f32 %v1634_v36, %v1460_v29  ;;  %v536_v43 = vpop.f32.mrb[3].mxu1  ;;  %v1133_v36 = vmul.f32 %v1994_v47, %v1994_v47 }
 0x23d   :  { %v537_v45 = vadd.f32 %v1460_v29, %v536_v43  ;;  %1661 = vmatprep.mubr.msk.f32.mxu0 %vm411_vm1, %v605_v35  ;;  %v1134_v43 = vmul.f32 %v2003_v50, %v2003_v50 }
 0x23e   :  { %1662 = vmatmul.mubr.msk.f32.vlgmr.msra.gmra.mrb[16].mxu0 %vm411_vm1, %v606_v37  ;;  %v608_v55 = vmul.f32 %v542_v38, %v1989_v46  ;;  %v1155_v38 = vsel %vm190_vm0, %v1133_v36, 0.0 }
 0x23f   :  { %v607_v49 = vmul.f32 %v537_v45, %v1970_v40  ;;  %v1637_v51 = vpop.f32.mrb[4].mxu1  ;;  %v1135_v45 = vmul.f32 %v2013_v53, %v2013_v53 }
 0x240   :  { %v552_v57 = vadd.f32 %v1637_v51, %v1460_v29  ;;  %v546_v60 = vpop.f32.mrb[5].mxu1 }
 0x241   :  { %v547_v1 = vadd.f32 %v1460_v29, %v546_v60  ;;  %1664 = vmatprep.mubr.msk.f32.mxu0 %vm411_vm1, %v607_v49  ;;  %v1158_v49 = vsel %vm190_vm0, %v1134_v43, 0.0  ;;  %v1161_v51 = vsel %vm190_vm0, %v1135_v45, 0.0 }
 0x242   :  { %1665 = vmatmul.mubr.msk.f32.gmra.mrb[18].mxu0 %vm411_vm1, %v608_v55  ;;  %v610_v2 = vmul.f32 %v552_v57, %v2008_v52  ;;  %v1136_v55 = vmul.f32 %v2023_v56, %v2023_v56  ;;  %v1137_v57 = vmul.f32 %v2038_v61, %v2038_v61 }
 0x243   :  { %v609_v41 = vmul.f32 %v547_v1, %v2015_v54  ;;  %v1640_v48 = vpop.f32.mrb[6].mxu1 }
 0x244   :  { %v562_v7 = vadd.f32 %v1640_v48, %v1460_v29  ;;  %v556_v8 = vpop.f32.mrb[7].mxu1  ;;  %v1164_v60 = vsel %vm190_vm0, %v1136_v55, 0.0  ;;  %v1167_v1 = vsel %vm190_vm0, %v1137_v57, 0.0  ;;  %v1139_v48 = vmul.f32 %v2058_v3, %v2058_v3 }
 0x245   :  { %v557_v13 = vadd.f32 %v1460_v29, %v556_v8  ;;  %1667 = vmatprep.mubr.msk.f32.mxu0 %vm411_vm1, %v609_v41  ;;  %v1138_v41 = vmul.f32 %v2043_v62, %v2043_v62  ;;  %v1140_v8 = vmul.f32 %v2063_v4, %v2063_v4 }
 0x246   :  { %1668 = vmatmul.mubr.msk.f32.gmra.mrb[20].mxu0 %vm411_vm1, %v610_v2  ;;  %v612_v14 = vmul.f32 %v562_v7, %v2028_v58  ;;  %v1173_v7 = vsel %vm190_vm0, %v1139_v48, 0.0 }
 0x247   :  { %v611_v40 = vmul.f32 %v557_v13, %v2030_v59  ;;  %v1643_v46 = vpop.f32.mrb[8].mxu1  ;;  %v1170_v2 = vsel %vm190_vm0, %v1138_v41, 0.0  ;;  %v1141_v13 = vmul.f32 %v2078_v9, %v2078_v9 }
 0x248   :  { %v572_v32 = vadd.f32 %v1643_v46, %v1460_v29  ;;  %v566_v18 = vpop.f32.mrb[9].mxu1 }
 0x249   :  { %v567_v19 = vadd.f32 %v1460_v29, %v566_v18  ;;  %1670 = vmatprep.mubr.msk.f32.mxu0 %vm411_vm1, %v611_v40  ;;  %v1176_v40 = vsel %vm190_vm0, %v1140_v8, 0.0  ;;  %v1179_v46 = vsel %vm190_vm0, %v1141_v13, 0.0 }
 0x24a   :  { %1671 = vmatmul.mubr.msk.f32.gmra.mrb[22].mxu0 %vm411_vm1, %v612_v14  ;;  %v614_v22 = vmul.f32 %v572_v32, %v2046_v63  ;;  %v1142_v14 = vmul.f32 %v2083_v10, %v2083_v10  ;;  %v1143_v32 = vmul.f32 %v2098_v15, %v2098_v15 }
 0x24b   :  { %v613_v52 = vmul.f32 %v567_v19, %v2048_v0  ;;  %v1646_v54 = vpop.f32.mrb[10].mxu1 }
 0x24c   :  { %v582_v23 = vadd.f32 %v1646_v54, %v1460_v29  ;;  %v576_v24 = vpop.f32.mrb[11].mxu1  ;;  %v1182_v18 = vsel %vm190_vm0, %v1142_v14, 0.0  ;;  %v1185_v19 = vsel %vm190_vm0, %v1143_v32, 0.0 }
 0x24d   :  { %v577_v25 = vadd.f32 %v1460_v29, %v576_v24  ;;  %1673 = vmatprep.mubr.msk.f32.mxu0 %vm411_vm1, %v613_v52  ;;  %v1477_v52 = vld [vmem:[%s2592_s7] ss:$0 sm:$0xff] }
 0x24e   :  { %1674 = vmatmul.mubr.msk.f32.gmra.mrb[24].mxu0 %vm411_vm1, %v614_v22  ;;  %v616_v26 = vmul.f32 %v582_v23, %v2066_v5 }
 0x24f   :  { %v615_v58 = vmul.f32 %v577_v25, %v2068_v6  ;;  %v1649_v59 = vpop.f32.mrb[12].mxu1 }
 0x250   :  { %v592_v27 = vadd.f32 %v1649_v59, %v1460_v29  ;;  %v586_v28 = vpop.f32.mrb[13].mxu1 }
 0x251   :  { %v587_v30 = vadd.f32 %v1460_v29, %v586_v28  ;;  %1676 = vmatprep.mubr.msk.f32.mxu0 %vm411_vm1, %v615_v58 }
 0x252   :  { %1677 = vmatmul.mubr.msk.f32.gmra.mrb[26].mxu0 %vm411_vm1, %v616_v26  ;;  %v618_v31 = vmul.f32 %v592_v27, %v2086_v11  ;;  %v1130_v11 = vmul.f32 %v1968_v39, %v1968_v39 }
 0x253   :  { %v617_v63 = vmul.f32 %v587_v30, %v2088_v12  ;;  %v1652_v0 = vpop.f32.mrb[14].mxu1  ;;  %v1131_v12 = vmul.f32 %v1984_v44, %v1984_v44 }
 0x254   :  { %v602_v33 = vadd.f32 %v1652_v0, %v1460_v29  ;;  %v596_v34 = vpop.f32.mrb[15].mxu1 }
 0x255   :  { %v597_v35 = vadd.f32 %v1460_v29, %v596_v34  ;;  %1679 = vmatprep.mubr.msk.f32.mxu0 %vm411_vm1, %v617_v63  ;;  %v1132_v29 = vmul.f32 %v1977_v42, %v1977_v42 }
 0x256   :  { %1680 = vmatmul.mubr.msk.f32.gmra.mrb[28].mxu0 %vm411_vm1, %v618_v31  ;;  %v620_v6 = vmul.f32 %v602_v33, %v2113_v20  ;;  %v1146_v20 = vsel %vm190_vm0, %v1130_v11, 0.0 }
 0x257   :  { %v619_v5 = vmul.f32 %v597_v35, %v2106_v17  ;;  %v1149_v17 = vsel %vm190_vm0, %v1131_v12, 0.0  ;;  %1147 = vadd.xlane.f32.xlu1 %v1146_v20  ;;  %v1152_v37 = vsel %vm190_vm0, %v1132_v29, 0.0 }
 0x258   :  { %1150 = vadd.xlane.f32.xlu0 %v1149_v17 }
 0x259   :  { %1682 = vmatprep.mubr.msk.f32.mxu0 %vm411_vm1, %v619_v5 }
 0x25a   :  { %1683 = vmatmul.mubr.msk.f32.gmra.mrb[30].mxu0 %vm411_vm1, %v620_v6 }
 0x25b   :  { %1156 = vadd.xlane.f32.xlu1 %v1155_v38 }
 0x25c   :  { %1153 = vadd.xlane.f32.xlu0 %v1152_v37 }
 0x25f   :  { %1162 = vadd.xlane.f32.xlu1 %v1161_v51 }
 0x260   :  { %1159 = vadd.xlane.f32.xlu0 %v1158_v49 }
 0x263   :  { %1168 = vadd.xlane.f32.xlu1 %v1167_v1 }
 0x264   :  { %1165 = vadd.xlane.f32.xlu0 %v1164_v60 }
 0x267   :  { %1174 = vadd.xlane.f32.xlu1 %v1173_v7 }
 0x268   :  { %1171 = vadd.xlane.f32.xlu0 %v1170_v2 }
 0x26b   :  { %1180 = vadd.xlane.f32.xlu1 %v1179_v46 }
 0x26c   :  { %1177 = vadd.xlane.f32.xlu0 %v1176_v40 }
 0x26f   :  { %1186 = vadd.xlane.f32.xlu1 %v1185_v19 }
 0x270   :  { %1183 = vadd.xlane.f32.xlu0 %v1182_v18 }
 0x311   :  { %v1663_v54 = vpop.f32.mrb[16].mxu0 }
 0x312   :  { %v752_v22 = vadd.f32 %v1663_v54, %v1477_v52  ;;  %v746_v23 = vpop.f32.mrb[17].mxu0 }
 0x313   :  { %v747_v24 = vadd.f32 %v1477_v52, %v746_v23  ;;  %v1145_v23 = vmul.f32 %v2118_v21, %v2118_v21 }
 0x314   :  { %v826_v59 = vmax.f32 %v752_v22, 0.0  ;;  %v1144_v22 = vmul.f32 %v2103_v16, %v2103_v16 }
 0x315   :  { %v825_v25 = vmax.f32 %v747_v24, 0.0  ;;  %v1666_v58 = vpop.f32.mrb[18].mxu0 }
 0x316   :  { %v762_v26 = vadd.f32 %v1666_v58, %v1477_v52  ;;  %v756_v27 = vpop.f32.mrb[19].mxu0  ;;  %v1188_v24 = vsel %vm190_vm0, %v1144_v22, 0.0 }
 0x317   :  { %v757_v28 = vadd.f32 %v1477_v52, %v756_v27  ;;  %1701 = vmatprep.mubr.msk.f32.mxu1 %vm856_vm2, %v825_v25  ;;  %1189 = vadd.xlane.f32.xlu0 %v1188_v24  ;;  %v2291_v25 = vld [vmem:[%s2593_s9] ss:$0 sm:$0xff] }
 0x318   :  { %1702 = vmatmul.mubr.msk.f32.vlgmr.msra.gmra.mrb[16].mxu1 %vm856_vm2, %v826_v59  ;;  %v828_v0 = vmax.f32 %v762_v26, 0.0 }
 0x319   :  { %v827_v30 = vmax.f32 %v757_v28, 0.0  ;;  %v1669_v63 = vpop.f32.mrb[20].mxu0 }
 0x31a   :  { %v772_v31 = vadd.f32 %v1669_v63, %v1477_v52  ;;  %v766_v33 = vpop.f32.mrb[21].mxu0 }
 0x31b   :  { %v767_v34 = vadd.f32 %v1477_v52, %v766_v33  ;;  %1704 = vmatprep.mubr.msk.f32.mxu1 %vm856_vm2, %v827_v30 }
 0x31c   :  { %1705 = vmatmul.mubr.msk.f32.gmra.mrb[18].mxu1 %vm856_vm2, %v828_v0  ;;  %v830_v6 = vmax.f32 %v772_v31, 0.0 }
 0x31d   :  { %v829_v35 = vmax.f32 %v767_v34, 0.0  ;;  %v1672_v5 = vpop.f32.mrb[22].mxu0 }
 0x31e   :  { %v782_v12 = vadd.f32 %v1672_v5, %v1477_v52  ;;  %v776_v11 = vpop.f32.mrb[23].mxu0 }
 0x31f   :  { %v777_v29 = vadd.f32 %v1477_v52, %v776_v11  ;;  %1707 = vmatprep.mubr.msk.f32.mxu1 %vm856_vm2, %v829_v35 }
 0x320   :  { %1708 = vmatmul.mubr.msk.f32.gmra.mrb[20].mxu1 %vm856_vm2, %v830_v6  ;;  %v832_v20 = vmax.f32 %v782_v12, 0.0 }
 0x321   :  { %v831_v36 = vmax.f32 %v777_v29, 0.0  ;;  %v1675_v17 = vpop.f32.mrb[24].mxu0 }
 0x322   :  { %v792_v37 = vadd.f32 %v1675_v17, %v1477_v52  ;;  %v786_v38 = vpop.f32.mrb[25].mxu0 }
 0x323   :  { %v787_v43 = vadd.f32 %v1477_v52, %v786_v38  ;;  %1710 = vmatprep.mubr.msk.f32.mxu1 %vm856_vm2, %v831_v36 }
 0x324   :  { %1711 = vmatmul.mubr.msk.f32.gmra.mrb[22].mxu1 %vm856_vm2, %v832_v20  ;;  %v834_v51 = vmax.f32 %v792_v37, 0.0 }
 0x325   :  { %v833_v45 = vmax.f32 %v787_v43, 0.0  ;;  %v1678_v49 = vpop.f32.mrb[26].mxu0 }
 0x326   :  { %v802_v55 = vadd.f32 %v1678_v49, %v1477_v52  ;;  %v796_v57 = vpop.f32.mrb[27].mxu0 }
 0x327   :  { %v797_v60 = vadd.f32 %v1477_v52, %v796_v57  ;;  %1713 = vmatprep.mubr.msk.f32.mxu1 %vm856_vm2, %v833_v45 }
 0x328   :  { %1714 = vmatmul.mubr.msk.f32.gmra.mrb[24].mxu1 %vm856_vm2, %v834_v51  ;;  %v836_v48 = vmax.f32 %v802_v55, 0.0 }
 0x329   :  { %v835_v1 = vmax.f32 %v797_v60, 0.0  ;;  %v1681_v41 = vpop.f32.mrb[28].mxu0 }
 0x32a   :  { %v812_v2 = vadd.f32 %v1681_v41, %v1477_v52  ;;  %v806_v7 = vpop.f32.mrb[29].mxu0 }
 0x32b   :  { %v807_v8 = vadd.f32 %v1477_v52, %v806_v7  ;;  %1716 = vmatprep.mubr.msk.f32.mxu1 %vm856_vm2, %v835_v1 }
 0x32c   :  { %1717 = vmatmul.mubr.msk.f32.gmra.mrb[26].mxu1 %vm856_vm2, %v836_v48  ;;  %v838_v46 = vmax.f32 %v812_v2, 0.0 }
 0x32d   :  { %v837_v13 = vmax.f32 %v807_v8, 0.0  ;;  %v1684_v40 = vpop.f32.mrb[30].mxu0 }
 0x32e   :  { %v822_v14 = vadd.f32 %v1684_v40, %v1477_v52  ;;  %v816_v32 = vpop.f32.mrb[31].mxu0 }
 0x32f   :  { %v817_v18 = vadd.f32 %v1477_v52, %v816_v32  ;;  %1719 = vmatprep.mubr.msk.f32.mxu1 %vm856_vm2, %v837_v13  ;;  %v1191_v52 = vsel %vm190_vm0, %v1145_v23, 0.0 }
 0x330   :  { %1720 = vmatmul.mubr.msk.f32.gmra.mrb[28].mxu1 %vm856_vm2, %v838_v46  ;;  %v840_v54 = vmax.f32 %v822_v14, 0.0  ;;  %1192 = vadd.xlane.f32.xlu1 %v1191_v52 }
 0x331   :  { %v839_v19 = vmax.f32 %v817_v18, 0.0 }
 0x333   :  { %1722 = vmatprep.mubr.msk.f32.mxu1 %vm856_vm2, %v839_v19 }
 0x334   :  { %1723 = vmatmul.mubr.msk.f32.gmra.mrb[30].mxu1 %vm856_vm2, %v840_v54 }
 0x3eb   :  { %v1703_v58 = vpop.f32.mrb[16].mxu1 }
 0x3ec   :  { %v977_v59 = vadd.f32 %v1703_v58, %v2291_v25  ;;  %v971_v26 = vpop.f32.mrb[17].mxu1 }
 0x3ed   :  { %v972_v27 = vadd.f32 %v2291_v25, %v971_v26 }
 0x3ee   :  { %1051 = vst.msk [vmem:[%s2594_s10 + $0x8] sm:$0xff] %vm190_vm0, %v977_v59  ;;  %v1195_v28 = vmul.f32 %v977_v59, %v977_v59  ;;  %v1067_v30 = vmul.f32 %v977_v59, %v1984_v44 }
 0x3ef   :  { %1050 = vst.msk [vmem:[%s2594_s10] sm:$0xff] %vm190_vm0, %v972_v27  ;;  %v1706_v63 = vpop.f32.mrb[18].mxu1  ;;  %v1066_v35 = vmul.f32 %v972_v27, %v1968_v39  ;;  %v1194_v12 = vmul.f32 %v972_v27, %v972_v27 }
 0x3f0   :  { %v987_v0 = vadd.f32 %v1706_v63, %v2291_v25  ;;  %v981_v31 = vpop.f32.mrb[19].mxu1  ;;  %v1213_v33 = vsel %vm190_vm0, %v1195_v28, 0.0  ;;  %v1085_v34 = vsel %vm190_vm0, %v1067_v30, 0.0 }
 0x3f1   :  { %v982_v5 = vadd.f32 %v2291_v25, %v981_v31  ;;  %1214 = vadd.xlane.f32.xlu1 %v1213_v33  ;;  %1086 = vadd.xlane.f32.xlu0 %v1085_v34  ;;  %v1082_v36 = vsel %vm190_vm0, %v1066_v35, 0.0  ;;  %v1210_v38 = vsel %vm190_vm0, %v1194_v12, 0.0 }
 0x3f2   :  { %1053 = vst.msk [vmem:[%s2594_s10 + $0x18] sm:$0xff] %vm190_vm0, %v987_v0  ;;  %v1197_v44 = vmul.f32 %v987_v0, %v987_v0  ;;  %v1069_v51 = vmul.f32 %v987_v0, %v1994_v47 }
 0x3f3   :  { %1052 = vst.msk [vmem:[%s2594_s10 + $0x10] sm:$0xff] %vm190_vm0, %v982_v5  ;;  %v1709_v6 = vpop.f32.mrb[20].mxu1  ;;  %v1068_v17 = vmul.f32 %v982_v5, %v1977_v42  ;;  %v1196_v60 = vmul.f32 %v982_v5, %v982_v5 }
 0x3f4   :  { %v997_v11 = vadd.f32 %v1709_v6, %v2291_v25  ;;  %v991_v39 = vpop.f32.mrb[21].mxu1  ;;  %v1219_v29 = vsel %vm190_vm0, %v1197_v44, 0.0  ;;  %v1091_v48 = vsel %vm190_vm0, %v1069_v51, 0.0 }
 0x3f5   :  { %v992_v20 = vadd.f32 %v2291_v25, %v991_v39  ;;  %1220 = vadd.xlane.f32.xlu1 %v1219_v29  ;;  %1083 = vadd.xlane.f32.xlu0 %v1082_v36  ;;  %v1088_v45 = vsel %vm190_vm0, %v1068_v17, 0.0  ;;  %v1216_v13 = vsel %vm190_vm0, %v1196_v60, 0.0 }
 0x3f6   :  { %1055 = vst.msk [vmem:[%s2594_s10 + $0x28] sm:$0xff] %vm190_vm0, %v997_v11  ;;  %v1199_v49 = vmul.f32 %v997_v11, %v997_v11  ;;  %v1071_v32 = vmul.f32 %v997_v11, %v2013_v53 }
 0x3f7   :  { %1054 = vst.msk [vmem:[%s2594_s10 + $0x20] sm:$0xff] %vm190_vm0, %v992_v20  ;;  %v1712_v37 = vpop.f32.mrb[22].mxu1  ;;  %v1070_v2 = vmul.f32 %v992_v20, %v2003_v50  ;;  %v1198_v54 = vmul.f32 %v992_v20, %v992_v20 }
 0x3f8   :  { %v1007_v43 = vadd.f32 %v1712_v37, %v2291_v25  ;;  %v1001_v42 = vpop.f32.mrb[23].mxu1  ;;  %v1225_v47 = vsel %vm190_vm0, %v1199_v49, 0.0  ;;  %v1097_v24 = vsel %vm190_vm0, %v1071_v32, 0.0 }
 0x3f9   :  { %v1002_v55 = vadd.f32 %v2291_v25, %v1001_v42  ;;  %1089 = vadd.xlane.f32.xlu1 %v1088_v45  ;;  %1211 = vadd.xlane.f32.xlu0 %v1210_v38  ;;  %v1094_v46 = vsel %vm190_vm0, %v1070_v2, 0.0  ;;  %v1222_v26 = vsel %vm190_vm0, %v1198_v54, 0.0 }
 0x3fa   :  { %1057 = vst.msk [vmem:[%s2594_s10 + $0x38] sm:$0xff] %vm190_vm0, %v1007_v43  ;;  %v1201_v14 = vmul.f32 %v1007_v43, %v1007_v43  ;;  %v1073_v63 = vmul.f32 %v1007_v43, %v2038_v61 }
 0x3fb   :  { %1056 = vst.msk [vmem:[%s2594_s10 + $0x30] sm:$0xff] %vm190_vm0, %v1002_v55  ;;  %v1715_v57 = vpop.f32.mrb[24].mxu1  ;;  %v1072_v52 = vmul.f32 %v1002_v55, %v2023_v56  ;;  %v1200_v34 = vmul.f32 %v1002_v55, %v1002_v55 }
 0x3fc   :  { %v1017_v1 = vadd.f32 %v1715_v57, %v2291_v25  ;;  %v1011_v41 = vpop.f32.mrb[25].mxu1  ;;  %v1231_v23 = vsel %vm190_vm0, %v1201_v14, 0.0  ;;  %v1103_v33 = vsel %vm190_vm0, %v1073_v63, 0.0 }
 0x3fd   :  { %v1012_v7 = vadd.f32 %v2291_v25, %v1011_v41  ;;  %1226 = vadd.xlane.f32.xlu1 %v1225_v47  ;;  %1092 = vadd.xlane.f32.xlu0 %v1091_v48  ;;  %v1100_v28 = vsel %vm190_vm0, %v1072_v52, 0.0  ;;  %v1228_v35 = vsel %vm190_vm0, %v1200_v34, 0.0  ;;  %v1148_v48 = vpop.xlane.xlu1 %1147 }
 0x3fe   :  { %1059 = vst.msk [vmem:[%s2594_s10 + $0x48] sm:$0xff] %vm190_vm0, %v1017_v1  ;;  %v1203_v30 = vmul.f32 %v1017_v1, %v1017_v1  ;;  %v1075_v44 = vmul.f32 %v1017_v1, %v2058_v3 }
 0x3ff   :  { %1058 = vst.msk [vmem:[%s2594_s10 + $0x40] sm:$0xff] %vm190_vm0, %v1012_v7  ;;  %v1718_v8 = vpop.f32.mrb[26].mxu1  ;;  %v1074_v61 = vmul.f32 %v1012_v7, %v2043_v62  ;;  %v1202_v11 = vmul.f32 %v1012_v7, %v1012_v7 }
 0x400   :  { %v2358_v40 = vadd.f32 %v1718_v8, %v2291_v25  ;;  %v1021_v50 = vpop.f32.mrb[27].mxu1  ;;  %v1237_v31 = vsel %vm190_vm0, %v1203_v30, 0.0  ;;  %v1109_v12 = vsel %vm190_vm0, %v1075_v44, 0.0 }
 0x401   :  { %v1022_v18 = vadd.f32 %v2291_v25, %v1021_v50  ;;  %1095 = vadd.xlane.f32.xlu1 %v1094_v46  ;;  %1217 = vadd.xlane.f32.xlu0 %v1216_v13  ;;  %v1234_v29 = vsel %vm190_vm0, %v1202_v11, 0.0  ;;  %v1157_v7 = vpop.xlane.xlu1 %1156 }
 0x402   :  { %1061 = vst.msk [vmem:[%s2594_s10 + $0x58] sm:$0xff] %vm190_vm0, %v2358_v40  ;;  %v1205_v5 = vmul.f32 %v2358_v40, %v2358_v40 }
 0x403   :  { %1060 = vst.msk [vmem:[%s2594_s10 + $0x50] sm:$0xff] %vm190_vm0, %v1022_v18  ;;  %v1721_v19 = vpop.f32.mrb[28].mxu1  ;;  %v1204_v17 = vmul.f32 %v1022_v18, %v1022_v18  ;;  %v1076_v37 = vmul.f32 %v1022_v18, %v2063_v4  ;;  %v1077_v4 = vmul.f32 %v2358_v40, %v2078_v9  ;;  %v1151_v9 = vpop.xlane.xlu0 %1150 }
 0x404   :  { %v2373_v22 = vadd.f32 %v1721_v19, %v2291_v25  ;;  %v1031_v53 = vpop.f32.mrb[29].mxu1  ;;  %v1243_v6 = vsel %vm190_vm0, %v1205_v5, 0.0 }
 0x405   :  { %v1032_v58 = vadd.f32 %v2291_v25, %v1031_v53  ;;  %1232 = vadd.xlane.f32.xlu1 %v1231_v23  ;;  %1098 = vadd.xlane.f32.xlu0 %v1097_v24  ;;  %v1240_v20 = vsel %vm190_vm0, %v1204_v17, 0.0  ;;  %v1112_v43 = vsel %vm190_vm0, %v1076_v37, 0.0  ;;  %v1115_v1 = vsel %vm190_vm0, %v1077_v4, 0.0  ;;  %v1163_v13 = vpop.xlane.xlu1 %1162 }
 0x406   :  { %1063 = vst.msk [vmem:[%s2594_s10 + $0x68] sm:$0xff] %vm190_vm0, %v2373_v22  ;;  %v1207_v62 = vmul.f32 %v2373_v22, %v2373_v22  ;;  %v1261_v24 = vmax.f32 %v1157_v7, 1e-24  ;;  %v1263_v30 = vmax.f32 %v1163_v13, 1e-24 }
 0x407   :  { %1062 = vst.msk [vmem:[%s2594_s10 + $0x60] sm:$0xff] %vm190_vm0, %v1032_v58  ;;  %v1724_v59 = vpop.f32.mrb[30].mxu1  ;;  %v1206_v38 = vmul.f32 %v1032_v58, %v1032_v58  ;;  %v1078_v45 = vmul.f32 %v1032_v58, %v2083_v10  ;;  %v1079_v10 = vmul.f32 %v2373_v22, %v2098_v15  ;;  %v1154_v2 = vpop.xlane.xlu0 %1153  ;;  %v1259_v22 = vmax.f32 %v1151_v9, 1e-24 }
 0x408   :  { %v1047_v56 = vadd.f32 %v1724_v59, %v2291_v25  ;;  %v1041_v27 = vpop.f32.mrb[31].mxu1  ;;  %v1249_v39 = vsel %vm190_vm0, %v1207_v62, 0.0 }
 0x409   :  { %v1042_v0 = vadd.f32 %v2291_v25, %v1041_v27  ;;  %1101 = vadd.xlane.f32.xlu1 %v1100_v28  ;;  %1223 = vadd.xlane.f32.xlu0 %v1222_v26  ;;  %v1106_v25 = vsel %vm190_vm0, %v1074_v61, 0.0  ;;  %v1246_v42 = vsel %vm190_vm0, %v1206_v38, 0.0  ;;  %v1118_v51 = vsel %vm190_vm0, %v1078_v45, 0.0  ;;  %v1169_v15 = vpop.xlane.xlu1 %1168 }
 0x40a   :  { %1065 = vst.msk [vmem:[%s2594_s10 + $0x78] sm:$0xff] %vm190_vm0, %v1047_v56  ;;  %v1209_v36 = vmul.f32 %v1047_v56, %v1047_v56  ;;  %v1121_v41 = vsel %vm190_vm0, %v1079_v10, 0.0  ;;  %v1081_v47 = vmul.f32 %v1047_v56, %v2118_v21  ;;  %1764 = vrsqrt.f32 %v1259_v22 }
 0x40b   :  { %1064 = vst.msk [vmem:[%s2594_s10 + $0x70] sm:$0xff] %vm190_vm0, %v1042_v0  ;;  %v1208_v49 = vmul.f32 %v1042_v0, %v1042_v0  ;;  %v1080_v57 = vmul.f32 %v1042_v0, %v2103_v16  ;;  %v2433_v8 = vpop.xlane.xlu0 %1159  ;;  %v1258_v26 = vmax.f32 %v1148_v48, 1e-24 }
 0x40c   :  { %v1255_v3 = vsel %vm190_vm0, %v1209_v36, 0.0  ;;  %v1127_v16 = vsel %vm190_vm0, %v1081_v47, 0.0 }
 0x40d   :  { %1238 = vadd.xlane.f32.xlu1 %v1237_v31  ;;  %1104 = vadd.xlane.f32.xlu0 %v1103_v33  ;;  %v1252_v55 = vsel %vm190_vm0, %v1208_v49, 0.0  ;;  %v1124_v60 = vsel %vm190_vm0, %v1080_v57, 0.0  ;;  %v2439_v46 = vpop.xlane.xlu1 %1174  ;;  %v1828_v57 = vld [vmem:[%s2584_s1 + $0x8] sm:$0xff] }
 0x40e   :  { %v1267_v7 = vmax.f32 %v2439_v46, 1e-24 }
 0x40f   :  { %v2435_v40 = vpop.xlane.xlu0 %1165 }
 0x411   :  { %1107 = vadd.xlane.f32.xlu1 %v1106_v25  ;;  %1229 = vadd.xlane.f32.xlu0 %v1228_v35  ;;  %v2443_v21 = vpop.xlane.xlu1 %1180  ;;  %v1260_v25 = vmax.f32 %v1154_v2, 1e-24 }
 0x413   :  { %v2437_v50 = vpop.xlane.xlu0 %1171 }
 0x414   :  { %v1765_v0 = vpop.eup %1764 }
 0x415   :  { %1244 = vadd.xlane.f32.xlu1 %v1243_v6  ;;  %1110 = vadd.xlane.f32.xlu0 %v1109_v12  ;;  %v2447_v18 = vpop.xlane.xlu1 %1186 }
 0x417   :  { %v2441_v14 = vpop.xlane.xlu0 %1177 }
 0x419   :  { %1250 = vadd.xlane.f32.xlu1 %v1249_v39  ;;  %1235 = vadd.xlane.f32.xlu0 %v1234_v29  ;;  %v2451_v54 = vpop.xlane.xlu1 %1192  ;;  %v1265_v29 = vmax.f32 %v1169_v15, 1e-24  ;;  %v1829_v15 = vld [vmem:[%s2584_s1 + $0x18] sm:$0xff] }
 0x41b   :  { %v2445_v32 = vpop.xlane.xlu0 %1183 }
 0x41d   :  { %1256 = vadd.xlane.f32.xlu1 %v1255_v3  ;;  %1241 = vadd.xlane.f32.xlu0 %v1240_v20 }
 0x41f   :  { %v2449_v19 = vpop.xlane.xlu0 %1189 }
 0x421   :  { %1113 = vadd.xlane.f32.xlu1 %v1112_v43  ;;  %1247 = vadd.xlane.f32.xlu0 %v1246_v42 }
 0x425   :  { %1119 = vadd.xlane.f32.xlu1 %v1118_v51  ;;  %1253 = vadd.xlane.f32.xlu0 %v1252_v55  ;;  %v1262_v51 = vmax.f32 %v2433_v8, 1e-24 }
 0x429   :  { %1125 = vadd.xlane.f32.xlu1 %v1124_v60  ;;  %1116 = vadd.xlane.f32.xlu0 %v1115_v1 }
 0x42d   :  { %1122 = vadd.xlane.f32.xlu0 %v1121_v41 }
 0x431   :  { %1128 = vadd.xlane.f32.xlu0 %v1127_v16 }
 0x47e   :  { %v1215_v53 = vpop.xlane.xlu1 %1214  ;;  %v1087_v23 = vpop.xlane.xlu0 %1086 }
 0x47f   :  { %v1307_v52 = vmax.f32 %v1215_v53, 1e-24  ;;  %v1291_v31 = vmul.f32 %v1765_v0, %v1087_v23 }
 0x481   :  { %1766 = vrsqrt.f32 %v1307_v52 }
 0x482   :  { %v1221_v58 = vpop.xlane.xlu1 %1220  ;;  %v1084_v59 = vpop.xlane.xlu0 %1083  ;;  %1768 = vrsqrt.f32 %v1261_v24 }
 0x483   :  { %v1309_v56 = vmax.f32 %v1221_v58, 1e-24 }
 0x485   :  { %1770 = vrsqrt.f32 %v1309_v56  ;;  %v1264_v56 = vmax.f32 %v2435_v40, 1e-24 }
 0x486   :  { %v1090_v27 = vpop.xlane.xlu1 %1089  ;;  %v1212_v28 = vpop.xlane.xlu0 %1211  ;;  %1772 = vrsqrt.f32 %v1258_v26 }
 0x487   :  { %v1306_v63 = vmax.f32 %v1212_v28, 1e-24 }
 0x489   :  { %1774 = vrsqrt.f32 %v1306_v63 }
 0x48a   :  { %v1227_v33 = vpop.xlane.xlu1 %1226  ;;  %v1093_v61 = vpop.xlane.xlu0 %1092  ;;  %1776 = vrsqrt.f32 %v1263_v30  ;;  %v1830_v30 = vld [vmem:[%s2584_s1] sm:$0xff] }
 0x48b   :  { %v1767_v34 = vpop.eup %1766  ;;  %v1311_v35 = vmax.f32 %v1227_v33, 1e-24 }
 0x48c   :  { %v1339_v5 = vmul.f32 %v1767_v34, %v1291_v31  ;;  %v1769_v44 = vpop.eup %1768 }
 0x48d   :  { %1778 = vrsqrt.f32 %v1311_v35  ;;  %v1293_v12 = vmul.f32 %v1769_v44, %v1093_v61 }
 0x48e   :  { %v1355_v6 = vsub.f32 1.0, %v1339_v5  ;;  %v2453_v62 = vpop.xlane.xlu1 %1095  ;;  %v1218_v11 = vpop.xlane.xlu0 %1217  ;;  %1780 = vrsqrt.f32 %v1260_v25 }
 0x48f   :  { %v1771_v39 = vpop.eup %1770  ;;  %v1308_v36 = vmax.f32 %v1218_v11, 1e-24 }
 0x490   :  { %v1371_v17 = vmax.f32 %v1355_v6, 0.0  ;;  %v1341_v3 = vmul.f32 %v1771_v39, %v1293_v12  ;;  %v1773_v20 = vpop.eup %1772  ;;  %v1831_v6 = vld [vmem:[%s2584_s1 + $0x28] sm:$0xff] }
 0x491   :  { %1782 = vrsqrt.f32 %v1308_v36  ;;  %v1290_v38 = vmul.f32 %v1773_v20, %v1084_v59 }
 0x492   :  { %v1387_v37 = vmul.f32 %v1371_v17, %v1371_v17  ;;  %v1357_v43 = vsub.f32 1.0, %v1341_v3  ;;  %v1233_v42 = vpop.xlane.xlu1 %1232  ;;  %v1099_v45 = vpop.xlane.xlu0 %1098  ;;  %1784 = vrsqrt.f32 %v1265_v29 }
 0x493   :  { %v1775_v49 = vpop.eup %1774  ;;  %v1313_v55 = vmax.f32 %v1233_v42, 1e-24 }
 0x494   :  { %v1403_v4 = vmul.f32 %v1828_v57, %v1387_v37  ;;  %v1338_v60 = vmul.f32 %v1775_v49, %v1290_v38  ;;  %v1373_v1 = vmax.f32 %v1357_v43, 0.0  ;;  %v1777_v10 = vpop.eup %1776  ;;  %v1266_v38 = vmax.f32 %v2437_v50, 1e-24  ;;  %v1832_v43 = vld [vmem:[%s2584_s1 + $0x10] sm:$0xff] }
 0x495   :  { %1786 = vrsqrt.f32 %v1313_v55  ;;  %v1295_v16 = vmul.f32 %v1777_v10, %v1099_v45  ;;  %v1269_v10 = vmax.f32 %v2443_v21, 1e-24 }
 0x496   :  { %1420 = vst.msk [vmem:[%s2595_s11 + $0x8] sm:$0xff] %vm1418_vm3, %v1403_v4  ;;  %v1354_v41 = vsub.f32 1.0, %v1338_v60  ;;  %v1389_v47 = vmul.f32 %v1373_v1, %v1373_v1  ;;  %v2463_v9 = vpop.xlane.xlu1 %1101  ;;  %v1224_v48 = vpop.xlane.xlu0 %1223  ;;  %1788 = vrsqrt.f32 %v1262_v51  ;;  %v1268_v51 = vmax.f32 %v2441_v14, 1e-24  ;;  %v1833_v14 = vld [vmem:[%s2584_s1 + $0x38] sm:$0xff] }
 0x497   :  { %v1779_v2 = vpop.eup %1778  ;;  %v1310_v8 = vmax.f32 %v1224_v48, 1e-24 }
 0x498   :  { %v1370_v13 = vmax.f32 %v1354_v41, 0.0  ;;  %v1405_v22 = vmul.f32 %v1829_v15, %v1389_v47  ;;  %v1343_v53 = vmul.f32 %v1779_v2, %v1295_v16  ;;  %v1781_v23 = vpop.eup %1780 }
 0x499   :  { %1790 = vrsqrt.f32 %v1310_v8  ;;  %v1292_v24 = vmul.f32 %v1781_v23, %v1090_v27  ;;  %v1270_v23 = vmax.f32 %v2445_v32, 1e-24 }
 0x49a   :  { %v1386_v52 = vmul.f32 %v1370_v13, %v1370_v13  ;;  %1422 = vst.msk [vmem:[%s2595_s11 + $0x18] sm:$0xff] %vm1418_vm3, %v1405_v22  ;;  %v1359_v58 = vsub.f32 1.0, %v1343_v53  ;;  %v1239_v59 = vpop.xlane.xlu1 %1238  ;;  %v1105_v46 = vpop.xlane.xlu0 %1104  ;;  %1792 = vrsqrt.f32 %v1267_v7 }
 0x49b   :  { %v1783_v26 = vpop.eup %1782  ;;  %v1315_v28 = vmax.f32 %v1239_v59, 1e-24 }
 0x49c   :  { %v1402_v63 = vmul.f32 %v1830_v30, %v1386_v52  ;;  %v1340_v27 = vmul.f32 %v1783_v26, %v1292_v24  ;;  %v1375_v0 = vmax.f32 %v1359_v58, 0.0  ;;  %v1785_v31 = vpop.eup %1784  ;;  %v1271_v52 = vmax.f32 %v2447_v18, 1e-24 }
 0x49d   :  { %1794 = vrsqrt.f32 %v1315_v28  ;;  %v1297_v34 = vmul.f32 %v1785_v31, %v1105_v46  ;;  %v1272_v18 = vmax.f32 %v2449_v19, 1e-24  ;;  %v1835_v31 = vld [vmem:[%s2584_s1 + $0x48] sm:$0xff] }
 0x49e   :  { %1419 = vst.msk [vmem:[%s2595_s11] sm:$0xff] %vm1418_vm3, %v1402_v63  ;;  %v1356_v33 = vsub.f32 1.0, %v1340_v27  ;;  %v1391_v61 = vmul.f32 %v1375_v0, %v1375_v0  ;;  %v2481_v40 = vpop.xlane.xlu1 %1107  ;;  %v1230_v25 = vpop.xlane.xlu0 %1229  ;;  %1796 = vrsqrt.f32 %v1264_v56  ;;  %v1273_v27 = vmax.f32 %v2451_v54, 1e-24 }
 0x49f   :  { %v1787_v35 = vpop.eup %1786  ;;  %v1312_v5 = vmax.f32 %v1230_v25, 1e-24 }
 0x4a0   :  { %v1372_v44 = vmax.f32 %v1356_v33, 0.0  ;;  %v1407_v12 = vmul.f32 %v1831_v6, %v1391_v61  ;;  %v1345_v11 = vmul.f32 %v1787_v35, %v1297_v34  ;;  %v1789_v39 = vpop.eup %1788  ;;  %v1836_v6 = vld [vmem:[%s2584_s1 + $0x30] sm:$0xff] }
 0x4a1   :  { %1798 = vrsqrt.f32 %v1312_v5  ;;  %v1294_v29 = vmul.f32 %v1789_v39, %v2453_v62 }
 0x4a2   :  { %v1388_v36 = vmul.f32 %v1372_v44, %v1372_v44  ;;  %1424 = vst.msk [vmem:[%s2595_s11 + $0x28] sm:$0xff] %vm1418_vm3, %v1407_v12  ;;  %v1361_v17 = vsub.f32 1.0, %v1345_v11  ;;  %v1245_v3 = vpop.xlane.xlu1 %1244  ;;  %v1111_v20 = vpop.xlane.xlu0 %1110  ;;  %1800 = vrsqrt.f32 %v1266_v38 }
 0x4a3   :  { %v1791_v37 = vpop.eup %1790  ;;  %1802 = vrsqrt.f32 %v1268_v51  ;;  %v1317_v7 = vmax.f32 %v1245_v3, 1e-24 }
 0x4a4   :  { %v1404_v42 = vmul.f32 %v1832_v43, %v1388_v36  ;;  %v1342_v45 = vmul.f32 %v1791_v37, %v1294_v29  ;;  %v1377_v49 = vmax.f32 %v1361_v17, 0.0  ;;  %v1793_v62 = vpop.eup %1792 }
 0x4a5   :  { %v1299_v4 = vmul.f32 %v1793_v62, %v1111_v20 }
 0x4a6   :  { %1421 = vst.msk [vmem:[%s2595_s11 + $0x10] sm:$0xff] %vm1418_vm3, %v1404_v42  ;;  %v1358_v55 = vsub.f32 1.0, %v1342_v45  ;;  %v1393_v57 = vmul.f32 %v1377_v49, %v1377_v49  ;;  %v1251_v60 = vpop.xlane.xlu1 %1250  ;;  %v1236_v50 = vpop.xlane.xlu0 %1235 }
 0x4a7   :  { %v1795_v1 = vpop.eup %1794  ;;  %v1314_v41 = vmax.f32 %v1236_v50, 1e-24  ;;  %v1319_v28 = vmax.f32 %v1251_v60, 1e-24 }
 0x4a8   :  { %v1374_v47 = vmax.f32 %v1358_v55, 0.0  ;;  %v1409_v16 = vmul.f32 %v1833_v14, %v1393_v57  ;;  %v1347_v48 = vmul.f32 %v1795_v1, %v1299_v4  ;;  %v1797_v2 = vpop.eup %1796  ;;  %v1837_v14 = vld [vmem:[%s2584_s1 + $0x40] sm:$0xff] }
 0x4a9   :  { %v1296_v8 = vmul.f32 %v1797_v2, %v2463_v9  ;;  %1804 = vrsqrt.f32 %v1314_v41  ;;  %v1834_v9 = vld [vmem:[%s2584_s1 + $0x20] sm:$0xff] }
 0x4aa   :  { %v1390_v13 = vmul.f32 %v1374_v47, %v1374_v47  ;;  %1426 = vst.msk [vmem:[%s2595_s11 + $0x38] sm:$0xff] %vm1418_vm3, %v1409_v16  ;;  %v1363_v21 = vsub.f32 1.0, %v1347_v48  ;;  %v1257_v15 = vpop.xlane.xlu1 %1256  ;;  %v1242_v22 = vpop.xlane.xlu0 %1241  ;;  %1806 = vrsqrt.f32 %v1269_v10 }
 0x4ab   :  { %v1799_v53 = vpop.eup %1798  ;;  %v1316_v24 = vmax.f32 %v1242_v22, 1e-24  ;;  %1808 = vrsqrt.f32 %v1317_v7  ;;  %v1321_v19 = vmax.f32 %v1257_v15, 1e-24 }
 0x4ac   :  { %v1406_v58 = vmul.f32 %v1834_v9, %v1390_v13  ;;  %v1344_v59 = vmul.f32 %v1799_v53, %v1296_v8  ;;  %v1379_v46 = vmax.f32 %v1363_v21, 0.0  ;;  %v1801_v61 = vpop.eup %1800 }
 0x4ad   :  { %1810 = vrsqrt.f32 %v1316_v24  ;;  %v1803_v35 = vpop.eup %1802  ;;  %v1298_v54 = vmul.f32 %v1801_v61, %v2481_v40 }
 0x4ae   :  { %1423 = vst.msk [vmem:[%s2595_s11 + $0x20] sm:$0xff] %vm1418_vm3, %v1406_v58  ;;  %v1360_v26 = vsub.f32 1.0, %v1344_v59  ;;  %v1395_v56 = vmul.f32 %v1379_v46, %v1379_v46  ;;  %v1248_v32 = vpop.xlane.xlu0 %1247  ;;  %1812 = vrsqrt.f32 %v1270_v23  ;;  %v1114_v30 = vpop.xlane.xlu1 %1113  ;;  %v1838_v46 = vld [vmem:[%s2584_s1 + $0x50] sm:$0xff] }
 0x4af   :  { %v1318_v63 = vmax.f32 %v1248_v32, 1e-24  ;;  %1814 = vrsqrt.f32 %v1271_v52  ;;  %v1300_v3 = vmul.f32 %v1803_v35, %v1114_v30 }
 0x4b0   :  { %v1376_v0 = vmax.f32 %v1360_v26, 0.0  ;;  %v1411_v33 = vmul.f32 %v1835_v31, %v1395_v56  ;;  %v1839_v56 = vld [vmem:[%s2584_s1 + $0x58] sm:$0xff]  ;;  %v1840_v31 = vld [vmem:[%s2584_s1 + $0x60] sm:$0xff] }
 0x4b1   :  { %1816 = vrsqrt.f32 %v1318_v63 }
 0x4b2   :  { %v1392_v34 = vmul.f32 %v1376_v0, %v1376_v0  ;;  %1428 = vst.msk [vmem:[%s2595_s11 + $0x48] sm:$0xff] %vm1418_vm3, %v1411_v33  ;;  %1818 = vrsqrt.f32 %v1319_v28  ;;  %v1254_v25 = vpop.xlane.xlu0 %1253  ;;  %v1120_v29 = vpop.xlane.xlu1 %1119 }
 0x4b3   :  { %1820 = vrsqrt.f32 %v1272_v18  ;;  %v1320_v5 = vmax.f32 %v1254_v25, 1e-24  ;;  %v1805_v44 = vpop.eup %1804 }
 0x4b4   :  { %1822 = vrsqrt.f32 %v1273_v27  ;;  %v1408_v12 = vmul.f32 %v1836_v6, %v1392_v34  ;;  %v1807_v11 = vpop.eup %1806  ;;  %v1346_v39 = vmul.f32 %v1805_v44, %v1298_v54  ;;  %v1841_v34 = vld [vmem:[%s2584_s1 + $0x68] sm:$0xff]  ;;  %v1843_v6 = vld [vmem:[%s2584_s1 + $0x78] sm:$0xff] }
 0x4b5   :  { %1824 = vrsqrt.f32 %v1320_v5  ;;  %v1809_v40 = vpop.eup %1808  ;;  %v1842_v5 = vld [vmem:[%s2584_s1 + $0x70] sm:$0xff] }
 0x4b6   :  { %1425 = vst.msk [vmem:[%s2595_s11 + $0x30] sm:$0xff] %vm1418_vm3, %v1408_v12  ;;  %1826 = vrsqrt.f32 %v1321_v19  ;;  %v1117_v36 = vpop.xlane.xlu0 %1116  ;;  %v1362_v17 = vsub.f32 1.0, %v1346_v39  ;;  %v1126_v60 = vpop.xlane.xlu1 %1125 }
 0x4b7   :  { %v1301_v20 = vmul.f32 %v1807_v11, %v1117_v36  ;;  %v1811_v37 = vpop.eup %1810 }
 0x4b8   :  { %v1813_v38 = vpop.eup %1812  ;;  %v1378_v43 = vmax.f32 %v1362_v17, 0.0  ;;  %v1348_v42 = vmul.f32 %v1811_v37, %v1300_v3 }
 0x4b9   :  { %v1349_v45 = vmul.f32 %v1809_v40, %v1301_v20  ;;  %v1815_v49 = vpop.eup %1814  ;;  %v1302_v62 = vmul.f32 %v1813_v38, %v1120_v29 }
 0x4ba   :  { %v1123_v51 = vpop.xlane.xlu0 %1122  ;;  %v1394_v57 = vmul.f32 %v1378_v43, %v1378_v43  ;;  %v1364_v4 = vsub.f32 1.0, %v1348_v42 }
 0x4bb   :  { %v1817_v55 = vpop.eup %1816  ;;  %v1365_v50 = vsub.f32 1.0, %v1349_v45  ;;  %v1303_v1 = vmul.f32 %v1815_v49, %v1123_v51 }
 0x4bc   :  { %v1819_v10 = vpop.eup %1818  ;;  %v1350_v41 = vmul.f32 %v1817_v55, %v1302_v62  ;;  %v1410_v16 = vmul.f32 %v1837_v14, %v1394_v57  ;;  %v1380_v48 = vmax.f32 %v1364_v4, 0.0 }
 0x4bd   :  { %v1821_v47 = vpop.eup %1820  ;;  %v1381_v2 = vmax.f32 %v1365_v50, 0.0  ;;  %v1351_v7 = vmul.f32 %v1819_v10, %v1303_v1 }
 0x4be   :  { %v1823_v8 = vpop.eup %1822  ;;  %v1366_v13 = vsub.f32 1.0, %v1350_v41  ;;  %v1304_v21 = vmul.f32 %v1821_v47, %v1126_v60  ;;  %v1129_v15 = vpop.xlane.xlu0 %1128  ;;  %1427 = vst.msk [vmem:[%s2595_s11 + $0x40] sm:$0xff] %vm1418_vm3, %v1410_v16  ;;  %v1396_v53 = vmul.f32 %v1380_v48, %v1380_v48 }
 0x4bf   :  { %v1825_v22 = vpop.eup %1824  ;;  %v1397_v23 = vmul.f32 %v1381_v2, %v1381_v2  ;;  %v1367_v24 = vsub.f32 1.0, %v1351_v7  ;;  %v1305_v52 = vmul.f32 %v1823_v8, %v1129_v15 }
 0x4c0   :  { %v1827_v9 = vpop.eup %1826  ;;  %v1382_v58 = vmax.f32 %v1366_v13, 0.0  ;;  %v1352_v59 = vmul.f32 %v1825_v22, %v1304_v21  ;;  %v1412_v26 = vmul.f32 %v1838_v46, %v1396_v53 }
 0x4c1   :  { %v1413_v28 = vmul.f32 %v1839_v56, %v1397_v23  ;;  %v1383_v32 = vmax.f32 %v1367_v24, 0.0  ;;  %v1353_v18 = vmul.f32 %v1827_v9, %v1305_v52 }
 0x4c2   :  { %v1398_v30 = vmul.f32 %v1382_v58, %v1382_v58  ;;  %v1368_v63 = vsub.f32 1.0, %v1352_v59  ;;  %1429 = vst.msk [vmem:[%s2595_s11 + $0x50] sm:$0xff] %vm1418_vm3, %v1412_v26 }
 0x4c3   :  { %1430 = vst.msk [vmem:[%s2595_s11 + $0x58] sm:$0xff] %vm1418_vm3, %v1413_v28  ;;  %v1399_v27 = vmul.f32 %v1383_v32, %v1383_v32  ;;  %v1369_v0 = vsub.f32 1.0, %v1353_v18 }
 0x4c4   :  { %v1414_v33 = vmul.f32 %v1840_v31, %v1398_v30  ;;  %v1384_v61 = vmax.f32 %v1368_v63, 0.0 }
 0x4c5   :  { %v1415_v19 = vmul.f32 %v1841_v34, %v1399_v27  ;;  %v1385_v25 = vmax.f32 %v1369_v0, 0.0 }
 0x4c6   :  { %1431 = vst.msk [vmem:[%s2595_s11 + $0x60] sm:$0xff] %vm1418_vm3, %v1414_v33  ;;  %v1400_v35 = vmul.f32 %v1384_v61, %v1384_v61 }
 0x4c7   :  { %1432 = vst.msk [vmem:[%s2595_s11 + $0x68] sm:$0xff] %vm1418_vm3, %v1415_v19  ;;  %v1401_v54 = vmul.f32 %v1385_v25, %v1385_v25 }
 0x4c8   :  { %v1416_v44 = vmul.f32 %v1842_v5, %v1400_v35 }
 0x4c9   :  { %v1417_v12 = vmul.f32 %v1843_v6, %v1401_v54 }
 0x4ca   :  { %1433 = vst.msk [vmem:[%s2595_s11 + $0x70] sm:$0xff] %vm1418_vm3, %v1416_v44 }
 0x4cb   :  { %1434 = vst.msk [vmem:[%s2595_s11 + $0x78] sm:$0xff] %vm1418_vm3, %v1417_v12 }

</bundles_post_ra>
